<compile_context>
chip_gen: v6e
topology: v6e:2x2x1
jax: 0.10.0
libtpu: 0.0.40
codegen_flags: <defaults>
</compile_context>

<pallas_src>
import jax
import jax.numpy as jnp
from jax.experimental import pallas as pl
from jax.experimental.pallas import tpu as pltpu


def _readout_kernel(h_ref, mask_ref, w1_ref, b1_ref, w2_ref, b2_ref,
                    w3_ref, b3_ref, w4_ref, b4_ref, o_ref):
    TB, Np, Fp = h_ref.shape
    Hp = w1_ref.shape[1]
    TBNp = TB * Np
    cdt = h_ref.dtype                                   # matmul compute dtype

    # ---- pre-sum Linear + SiLU over all TB*Np node rows (one MXU matmul) ----
    h = h_ref[...].reshape(TBNp, Fp)                    # pure relabel (Np%16==0)
    x = jnp.dot(h, w1_ref[...], preferred_element_type=jnp.float32)
    x = x + b1_ref[...]
    x = x * jax.nn.sigmoid(x)                           # SiLU in f32

    # ---- masked node pooling on the MXU via a block-diagonal selector -------
    #   pooled[b, :] = sum_n mask[b, n] * x[b*Np + n, :]
    row = jax.lax.broadcasted_iota(jnp.int32, (TB, TBNp), 0)
    col = jax.lax.broadcasted_iota(jnp.int32, (TB, TBNp), 1)
    lo = row * Np
    block_diag = (col >= lo) & (col < lo + Np)
    mask_row = mask_ref[...].reshape(1, TBNp)           # lane-dense mask, f32
    sel = jnp.where(block_diag, mask_row, 0.0)          # (TB, TB*Np) f32
    pooled = jnp.dot(sel.astype(cdt), x.astype(cdt),
                     preferred_element_type=jnp.float32)        # (TB, Hp) f32
    n_valid = jnp.sum(sel, axis=1, keepdims=True)       # (TB, 1) = #valid nodes

    # ---- W2 folded through the (linear) pooling: pooled @ W2 + n_valid*b2 ---
    x2 = jnp.dot(pooled, w2_ref[...], preferred_element_type=jnp.float32)
    x2 = x2 + n_valid * b2_ref[...]

    # ---- post-sum MLP on the TB pooled rows only (tiny, kept in f32) --------
    y = jnp.dot(x2, w3_ref[...], preferred_element_type=jnp.float32) + b3_ref[...]
    y = y * jax.nn.sigmoid(y)
    y = jnp.dot(y, w4_ref[...], preferred_element_type=jnp.float32) + b4_ref[...]

    o_ref[...] = y.astype(o_ref.dtype)                  # (TB, Op) dense store


def _round_up(x, m):
    return (x + m - 1) // m * m


def _vmem_limit_bytes():
    """Scoped VMEM limit: ~3/4 of physical capacity, capped at 100 MiB."""
    try:
        cap = int(pltpu.get_tpu_info().vmem_capacity_bytes)
    except Exception:
        cap = 64 * 2 ** 20            # conservative (v7x-sized) fallback
    return min(cap * 3 // 4, 100 * 2 ** 20)


def _est_vmem_bytes(tb, Np, Fp, Hp, Op):
    """Rough live-VMEM estimate for one grid step at batch tile tb."""
    bf16, f32, i32 = 2, 4, 4
    est = 2 * tb * Np * Fp * bf16                        # h block (double-buffered)
    est += 2 * tb * Np * f32                             # mask block
    est += 2 * tb * Op * f32                             # output block
    est += Fp * Hp * bf16                                # W1 (single-buffered)
    est += (2 * Hp * Hp + Hp * Op + 3 * Hp + Op) * f32   # W2..W4, biases
    est += tb * Np * Hp * f32                            # SiLU activations
    est += tb * tb * Np * (2 * i32 + f32 + bf16)         # iota / selector temps
    return est


def _pick_batch_tile(B, Np, Fp, Hp, Op, *, target_rows=1024):
    """Batch elements per grid step.

    Sized so TB*Np node rows feed the MXU well past the per-step pipeline
    overhead (~512-1024+ rows), then shrunk only if the VMEM estimate exceeds
    the scoped budget.  No shrinking just to create extra grid steps.
    """
    budget = _vmem_limit_bytes() * 7 // 10
    cap = _round_up(max(B, 1), 8)                        # never pad B by >7 rows
    tb = max(16, (target_rows // max(Np, 1)) // 16 * 16)
    tb = min(tb, cap)
    while tb > 16 and _est_vmem_bytes(tb, Np, Fp, Hp, Op) > budget:
        tb -= 16
    if tb < cap:                                         # multi-block output:
        tb = max(16, tb // 16 * 16)                      # keep sublane-aligned
    return tb


def readout_forward(h, mask, params, *, batch_tile=None,
                    compute_dtype=jnp.bfloat16):
    """h: (B, N, F), mask: (B, N, 1) or (B, N)  ->  (B, out_features)."""
    B, N, F = h.shape
    w1, b1, w2, b2, w3, b3, w4, b4 = params
    H = w1.shape[1]
    O = w4.shape[1]

    # Pad node / lane / contraction dims to the vreg & MXU grain.
    Np = _round_up(N, 16)          # bf16 sublane tile -> reshapes are relabels
    Fp = _round_up(F, 128)
    Hp = _round_up(H, 128)
    Op = _round_up(O, 128)         # lane-dense output store

    TB = batch_tile if batch_tile is not None else _pick_batch_tile(
        B, Np, Fp, Hp, Op)
    Bp = _round_up(B, TB)          # pad batch instead of shrinking the tile
    grid = (Bp // TB,)

    # Inputs: h in bf16 (MXU operand); mask flattened lane-dense per batch tile.
    hp = jnp.pad(h, ((0, Bp - B), (0, Np - N), (0, Fp - F))).astype(compute_dtype)
    mp = jnp.pad(mask.reshape(B, N).astype(jnp.float32),
                 ((0, Bp - B), (0, Np - N)))
    mp = mp.reshape(Bp // TB, 1, TB * Np)                # one row per grid step

    # Weights: W1 in bf16 (dominant per-node matmul); the tiny post-pool
    # matmuls + all biases stay f32 so node sums are never rounded to bf16.
    def pad_w(w, r, c, dt):
        return jnp.pad(w, ((0, r - w.shape[0]), (0, c - w.shape[1]))).astype(dt)

    def pad_b(b, c):
        b = b.reshape(1, -1)
        return jnp.pad(b, ((0, 0), (0, c - b.shape[1]))).astype(jnp.float32)

    w1p = pad_w(w1, Fp, Hp, compute_dtype)
    w2p = pad_w(w2, Hp, Hp, jnp.float32)
    w3p = pad_w(w3, Hp, Hp, jnp.float32)
    w4p = pad_w(w4, Hp, Op, jnp.float32)
    b1p, b2p, b3p, b4p = pad_b(b1, Hp), pad_b(b2, Hp), pad_b(b3, Hp), pad_b(b4, Op)

    vmem_limit = _vmem_limit_bytes()
    cost = pl.CostEstimate(
        flops=2 * Bp * Np * Hp * (Fp + TB) + 2 * Bp * Hp * (2 * Hp + Op),
        transcendentals=Bp * Np * Hp + Bp * Hp,
        bytes_accessed=(hp.size * hp.dtype.itemsize + mp.size * 4
                        + Bp * Op * h.dtype.itemsize + w1p.size * 2
                        + (w2p.size + w3p.size + w4p.size) * 4),
    )

    def call(single_buffer_weights):
        def const_spec(arr):
            nd = arr.ndim
            if single_buffer_weights:      # grid-invariant: fetch once, 1 buffer
                return pl.BlockSpec(arr.shape, lambda b: (0,) * nd,
                                    pipeline_mode=pl.Buffered(1))
            return pl.BlockSpec(arr.shape, lambda b: (0,) * nd)

        return pl.pallas_call(
            _readout_kernel,
            out_shape=jax.ShapeDtypeStruct((Bp, Op), h.dtype),
            grid_spec=pltpu.PrefetchScalarGridSpec(
                num_scalar_prefetch=0,
                grid=grid,
                in_specs=[
                    pl.BlockSpec((TB, Np, Fp), lambda b: (b, 0, 0)),     # h
                    pl.BlockSpec((1, 1, TB * Np), lambda b: (b, 0, 0)),  # mask
                    const_spec(w1p), const_spec(b1p),
                    const_spec(w2p), const_spec(b2p),
                    const_spec(w3p), const_spec(b3p),
                    const_spec(w4p), const_spec(b4p),
                ],
                out_specs=pl.BlockSpec((TB, Op), lambda b: (b, 0)),
            ),
            compiler_params=pltpu.CompilerParams(
                dimension_semantics=("parallel",),
                vmem_limit_bytes=int(vmem_limit)),
            cost_estimate=cost,
        )(hp, mp, w1p, b1p, w2p, b2p, w3p, b3p, w4p, b4p)

    try:
        out = call(True)     # single-buffered grid-invariant weights
    except Exception:
        out = call(False)    # fall back if Buffered(1) is unsupported

    return out[:B, :O]


def init_params(key, in_features, hidden_features, out_features,
                dtype=jnp.float32):
    ks = jax.random.split(key, 8)

    def lin(kw, kb, fin, fout):
        bound = 1.0 / jnp.sqrt(fin)
        w = jax.random.uniform(kw, (fin, fout), dtype, -bound, bound)
        b = jax.random.uniform(kb, (1, fout), dtype, -bound, bound)
        return w, b

    w1, b1 = lin(ks[0], ks[1], in_features, hidden_features)
    w2, b2 = lin(ks[2], ks[3], hidden_features, hidden_features)
    w3, b3 = lin(ks[4], ks[5], hidden_features, hidden_features)
    w4, b4 = lin(ks[6], ks[7], hidden_features, out_features)
    return (w1, b1, w2, b2, w3, b3, w4, b4)


def readout_reference(h, mask, params):
    """Pure-JAX f32 reference (mirrors the PyTorch forward exactly)."""
    w1, b1, w2, b2, w3, b3, w4, b4 = params
    x = jax.nn.silu(h @ w1 + b1) @ w2 + b2
    x = x * mask
    x = x.sum(axis=-2)
    y = jax.nn.silu(x @ w3 + b3) @ w4 + b4
    return y


if __name__ == "__main__":
    key = jax.random.PRNGKey(0)
    k_h, k_m, k_p = jax.random.split(key, 3)

    # batch, nodes, in_features, hidden, out
    B, N, F, H, O = 8, 8, 32, 32, 1

    h = jax.random.normal(k_h, (B, N, F), jnp.float32)
    mask = (jax.random.uniform(k_m, (B, N, 1)) > 0.3).astype(jnp.float32)
    params = init_params(k_p, F, H, O)

    out = readout_forward(h, mask, params)
    out = jax.block_until_ready(out)

    ref = readout_reference(h, mask, params)
    assert out.shape == (B, O), out.shape
    # Tolerance accounts for bf16 inputs / W1 / pooled activations (f32
    # accumulation everywhere); post-pool matmuls are full f32.
    assert jnp.allclose(out, ref, atol=5e-2, rtol=5e-2), (out, ref)

    print("KERNEL_OK")
</pallas_src>

<mosaic_0001>
module attributes {stable_mosaic.version = 11 : i64} {
  func.func @_readout_kernel(%arg0: i32, %arg1: memref<8x16x128xbf16, #tpu.memory_space<vmem>>, %arg2: memref<1x1x128xf32, #tpu.memory_space<vmem>>, %arg3: memref<128x128xbf16, #tpu.memory_space<vmem>>, %arg4: memref<1x128xf32, #tpu.memory_space<vmem>>, %arg5: memref<128x128xf32, #tpu.memory_space<vmem>>, %arg6: memref<1x128xf32, #tpu.memory_space<vmem>>, %arg7: memref<128x128xf32, #tpu.memory_space<vmem>>, %arg8: memref<1x128xf32, #tpu.memory_space<vmem>>, %arg9: memref<128x128xf32, #tpu.memory_space<vmem>>, %arg10: memref<1x128xf32, #tpu.memory_space<vmem>>, %arg11: memref<8x128xf32, #tpu.memory_space<vmem>>) attributes {dimension_semantics = [#tpu.dimension_semantics<parallel>], iteration_bounds = array<i64: 1>, scalar_prefetch = 0 : i64, scratch_operands = 0 : i64, tpu.core_type = #tpu.core_type<tc>, window_params = [{transform_indices = @transform_0, window_bounds = array<i64: 8, 16, 128>}, {transform_indices = @transform_1, window_bounds = array<i64: 1, 1, 128>}, {pipeline_mode = #tpu.pipeline_mode<synchronous>, transform_indices = @transform_2, window_bounds = array<i64: 128, 128>}, {pipeline_mode = #tpu.pipeline_mode<synchronous>, transform_indices = @transform_3, window_bounds = array<i64: 1, 128>}, {pipeline_mode = #tpu.pipeline_mode<synchronous>, transform_indices = @transform_4, window_bounds = array<i64: 128, 128>}, {pipeline_mode = #tpu.pipeline_mode<synchronous>, transform_indices = @transform_5, window_bounds = array<i64: 1, 128>}, {pipeline_mode = #tpu.pipeline_mode<synchronous>, transform_indices = @transform_6, window_bounds = array<i64: 128, 128>}, {pipeline_mode = #tpu.pipeline_mode<synchronous>, transform_indices = @transform_7, window_bounds = array<i64: 1, 128>}, {pipeline_mode = #tpu.pipeline_mode<synchronous>, transform_indices = @transform_8, window_bounds = array<i64: 128, 128>}, {pipeline_mode = #tpu.pipeline_mode<synchronous>, transform_indices = @transform_9, window_bounds = array<i64: 1, 128>}, {transform_indices = @transform_10, window_bounds = array<i64: 8, 128>}]} {
    %c0 = arith.constant 0 : index
    %c0_0 = arith.constant 0 : index
    %c0_1 = arith.constant 0 : index
    %0 = vector.load %arg1[%c0, %c0_0, %c0_1] : memref<8x16x128xbf16, #tpu.memory_space<vmem>>, vector<8x16x128xbf16>
    %1 = vector.shape_cast %0 : vector<8x16x128xbf16> to vector<128x128xbf16>
    %c0_2 = arith.constant 0 : index
    %c0_3 = arith.constant 0 : index
    %2 = vector.load %arg3[%c0_2, %c0_3] : memref<128x128xbf16, #tpu.memory_space<vmem>>, vector<128x128xbf16>
    %cst = arith.constant dense<0.000000e+00> : vector<128x128xf32>
    %3 = tpu.matmul %1, %2, %cst {dimension_numbers = #tpu.dot_dimension_numbers<[1], [0], [0], [1], [0, 0, 1, 1], [], []>} : vector<128x128xbf16>, vector<128x128xbf16>, vector<128x128xf32> -> vector<128x128xf32>
    %c0_4 = arith.constant 0 : index
    %c0_5 = arith.constant 0 : index
    %4 = vector.load %arg4[%c0_4, %c0_5] : memref<1x128xf32, #tpu.memory_space<vmem>>, vector<1x128xf32>
    %5 = vector.broadcast %4 : vector<1x128xf32> to vector<128x128xf32>
    %6 = arith.addf %3, %5 : vector<128x128xf32>
    %7 = arith.negf %6 : vector<128x128xf32>
    %8 = math.exp %7 : vector<128x128xf32>
    %cst_6 = arith.constant 1.000000e+00 : f32
    %9 = vector.broadcast %cst_6 : f32 to vector<128x128xf32>
    %10 = arith.addf %9, %8 : vector<128x128xf32>
    %11 = arith.divf %9, %10 : vector<128x128xf32>
    %12 = arith.mulf %6, %11 : vector<128x128xf32>
    %13 = tpu.iota {dimensions = array<i32: 0>} : vector<8x128xi32>
    %14 = tpu.iota {dimensions = array<i32: 1>} : vector<8x128xi32>
    %c16_i32 = arith.constant 16 : i32
    %15 = vector.broadcast %c16_i32 : i32 to vector<8x128xi32>
    %16 = arith.muli %13, %15 : vector<8x128xi32>
    %17 = arith.cmpi sge, %14, %16 : vector<8x128xi32>
    %c16_i32_7 = arith.constant 16 : i32
    %18 = vector.broadcast %c16_i32_7 : i32 to vector<8x128xi32>
    %19 = arith.addi %16, %18 : vector<8x128xi32>
    %20 = arith.cmpi slt, %14, %19 : vector<8x128xi32>
    %21 = arith.andi %17, %20 : vector<8x128xi1>
    %c0_8 = arith.constant 0 : index
    %c0_9 = arith.constant 0 : index
    %c0_10 = arith.constant 0 : index
    %22 = vector.load %arg2[%c0_8, %c0_9, %c0_10] : memref<1x1x128xf32, #tpu.memory_space<vmem>>, vector<1x1x128xf32>
    %23 = vector.shape_cast %22 : vector<1x1x128xf32> to vector<1x128xf32>
    %cst_11 = arith.constant 0.000000e+00 : f32
    %24 = vector.shape_cast %23 : vector<1x128xf32> to vector<1x128xf32>
    %25 = vector.broadcast %24 : vector<1x128xf32> to vector<8x128xf32>
    %26 = vector.broadcast %cst_11 : f32 to vector<8x128xf32>
    %27 = arith.select %21, %25, %26 : vector<8x128xi1>, vector<8x128xf32>
    %28 = arith.truncf %27 : vector<8x128xf32> to vector<8x128xbf16>
    %29 = arith.truncf %12 : vector<128x128xf32> to vector<128x128xbf16>
    %cst_12 = arith.constant dense<0.000000e+00> : vector<8x128xf32>
    %30 = tpu.matmul %28, %29, %cst_12 {dimension_numbers = #tpu.dot_dimension_numbers<[1], [0], [0], [1], [0, 0, 1, 1], [], []>} : vector<8x128xbf16>, vector<128x128xbf16>, vector<8x128xf32> -> vector<8x128xf32>
    %cst_13 = arith.constant dense<0.000000e+00> : vector<8xf32>
    %31 = vector.multi_reduction <add>, %27, %cst_13 [1] : vector<8x128xf32> to vector<8xf32>
    %32 = vector.shape_cast %31 : vector<8xf32> to vector<8x1xf32>
    %c0_14 = arith.constant 0 : index
    %c0_15 = arith.constant 0 : index
    %33 = vector.load %arg5[%c0_14, %c0_15] : memref<128x128xf32, #tpu.memory_space<vmem>>, vector<128x128xf32>
    %cst_16 = arith.constant dense<0.000000e+00> : vector<8x128xf32>
    %34 = tpu.matmul %30, %33, %cst_16 {dimension_numbers = #tpu.dot_dimension_numbers<[1], [0], [0], [1], [0, 0, 1, 1], [], []>} : vector<8x128xf32>, vector<128x128xf32>, vector<8x128xf32> -> vector<8x128xf32>
    %c0_17 = arith.constant 0 : index
    %c0_18 = arith.constant 0 : index
    %35 = vector.load %arg6[%c0_17, %c0_18] : memref<1x128xf32, #tpu.memory_space<vmem>>, vector<1x128xf32>
    %36 = vector.broadcast %32 : vector<8x1xf32> to vector<8x128xf32>
    %37 = vector.broadcast %35 : vector<1x128xf32> to vector<8x128xf32>
    %38 = arith.mulf %36, %37 : vector<8x128xf32>
    %39 = arith.addf %34, %38 : vector<8x128xf32>
    %c0_19 = arith.constant 0 : index
    %c0_20 = arith.constant 0 : index
    %40 = vector.load %arg7[%c0_19, %c0_20] : memref<128x128xf32, #tpu.memory_space<vmem>>, vector<128x128xf32>
    %cst_21 = arith.constant dense<0.000000e+00> : vector<8x128xf32>
    %41 = tpu.matmul %39, %40, %cst_21 {dimension_numbers = #tpu.dot_dimension_numbers<[1], [0], [0], [1], [0, 0, 1, 1], [], []>} : vector<8x128xf32>, vector<128x128xf32>, vector<8x128xf32> -> vector<8x128xf32>
    %c0_22 = arith.constant 0 : index
    %c0_23 = arith.constant 0 : index
    %42 = vector.load %arg8[%c0_22, %c0_23] : memref<1x128xf32, #tpu.memory_space<vmem>>, vector<1x128xf32>
    %43 = vector.broadcast %42 : vector<1x128xf32> to vector<8x128xf32>
    %44 = arith.addf %41, %43 : vector<8x128xf32>
    %45 = arith.negf %44 : vector<8x128xf32>
    %46 = math.exp %45 : vector<8x128xf32>
    %cst_24 = arith.constant 1.000000e+00 : f32
    %47 = vector.broadcast %cst_24 : f32 to vector<8x128xf32>
    %48 = arith.addf %47, %46 : vector<8x128xf32>
    %49 = arith.divf %47, %48 : vector<8x128xf32>
    %50 = arith.mulf %44, %49 : vector<8x128xf32>
    %c0_25 = arith.constant 0 : index
    %c0_26 = arith.constant 0 : index
    %51 = vector.load %arg9[%c0_25, %c0_26] : memref<128x128xf32, #tpu.memory_space<vmem>>, vector<128x128xf32>
    %cst_27 = arith.constant dense<0.000000e+00> : vector<8x128xf32>
    %52 = tpu.matmul %50, %51, %cst_27 {dimension_numbers = #tpu.dot_dimension_numbers<[1], [0], [0], [1], [0, 0, 1, 1], [], []>} : vector<8x128xf32>, vector<128x128xf32>, vector<8x128xf32> -> vector<8x128xf32>
    %c0_28 = arith.constant 0 : index
    %c0_29 = arith.constant 0 : index
    %53 = vector.load %arg10[%c0_28, %c0_29] : memref<1x128xf32, #tpu.memory_space<vmem>>, vector<1x128xf32>
    %54 = vector.broadcast %53 : vector<1x128xf32> to vector<8x128xf32>
    %55 = arith.addf %52, %54 : vector<8x128xf32>
    %c0_30 = arith.constant 0 : index
    %c0_31 = arith.constant 0 : index
    %56 = vector.load %arg11[%c0_30, %c0_31] : memref<8x128xf32, #tpu.memory_space<vmem>>, vector<8x128xf32>
    tpu.vector_store %arg11[%c0_30, %c0_31], %55 {strides = array<i32>} : memref<8x128xf32, #tpu.memory_space<vmem>>, vector<8x128xf32>,
    return
  }
  func.func @transform_0(%arg0: i32) -> (i32, i32, i32) {
    %c0_i32 = arith.constant 0 : i32
    %c0_i32_0 = arith.constant 0 : i32
    %c0_i32_1 = arith.constant 0 : i32
    return %arg0, %c0_i32, %c0_i32_0 : i32, i32, i32
  }
  func.func @transform_1(%arg0: i32) -> (i32, i32, i32) {
    %c0_i32 = arith.constant 0 : i32
    %c0_i32_0 = arith.constant 0 : i32
    %c0_i32_1 = arith.constant 0 : i32
    return %arg0, %c0_i32, %c0_i32_0 : i32, i32, i32
  }
  func.func @transform_2(%arg0: i32) -> (i32, i32) {
    %c0_i32 = arith.constant 0 : i32
    %c0_i32_0 = arith.constant 0 : i32
    %c0_i32_1 = arith.constant 0 : i32
    return %c0_i32, %c0_i32_0 : i32, i32
  }
  func.func @transform_3(%arg0: i32) -> (i32, i32) {
    %c0_i32 = arith.constant 0 : i32
    %c0_i32_0 = arith.constant 0 : i32
    %c0_i32_1 = arith.constant 0 : i32
    return %c0_i32, %c0_i32_0 : i32, i32
  }
  func.func @transform_4(%arg0: i32) -> (i32, i32) {
    %c0_i32 = arith.constant 0 : i32
    %c0_i32_0 = arith.constant 0 : i32
    %c0_i32_1 = arith.constant 0 : i32
    return %c0_i32, %c0_i32_0 : i32, i32
  }
  func.func @transform_5(%arg0: i32) -> (i32, i32) {
    %c0_i32 = arith.constant 0 : i32
    %c0_i32_0 = arith.constant 0 : i32
    %c0_i32_1 = arith.constant 0 : i32
    return %c0_i32, %c0_i32_0 : i32, i32
  }
  func.func @transform_6(%arg0: i32) -> (i32, i32) {
    %c0_i32 = arith.constant 0 : i32
    %c0_i32_0 = arith.constant 0 : i32
    %c0_i32_1 = arith.constant 0 : i32
    return %c0_i32, %c0_i32_0 : i32, i32
  }
  func.func @transform_7(%arg0: i32) -> (i32, i32) {
    %c0_i32 = arith.constant 0 : i32
    %c0_i32_0 = arith.constant 0 : i32
    %c0_i32_1 = arith.constant 0 : i32
    return %c0_i32, %c0_i32_0 : i32, i32
  }
  func.func @transform_8(%arg0: i32) -> (i32, i32) {
    %c0_i32 = arith.constant 0 : i32
    %c0_i32_0 = arith.constant 0 : i32
    %c0_i32_1 = arith.constant 0 : i32
    return %c0_i32, %c0_i32_0 : i32, i32
  }
  func.func @transform_9(%arg0: i32) -> (i32, i32) {
    %c0_i32 = arith.constant 0 : i32
    %c0_i32_0 = arith.constant 0 : i32
    %c0_i32_1 = arith.constant 0 : i32
    return %c0_i32, %c0_i32_0 : i32, i32
  }
  func.func @transform_10(%arg0: i32) -> (i32, i32) {
    %c0_i32 = arith.constant 0 : i32
    %c0_i32_0 = arith.constant 0 : i32
    return %arg0, %c0_i32 : i32, i32
  }
}

module attributes {stable_mosaic.version = 11 : i64} {
  func.func @_readout_kernel(%arg0: i32, %arg1: memref<8x16x128xbf16, #tpu.memory_space<vmem>>, %arg2: memref<1x1x128xf32, #tpu.memory_space<vmem>>, %arg3: memref<128x128xbf16, #tpu.memory_space<vmem>>, %arg4: memref<1x128xf32, #tpu.memory_space<vmem>>, %arg5: memref<128x128xf32, #tpu.memory_space<vmem>>, %arg6: memref<1x128xf32, #tpu.memory_space<vmem>>, %arg7: memref<128x128xf32, #tpu.memory_space<vmem>>, %arg8: memref<1x128xf32, #tpu.memory_space<vmem>>, %arg9: memref<128x128xf32, #tpu.memory_space<vmem>>, %arg10: memref<1x128xf32, #tpu.memory_space<vmem>>, %arg11: memref<8x128xf32, #tpu.memory_space<vmem>>) attributes {dimension_semantics = [#tpu.dimension_semantics<parallel>], iteration_bounds = array<i64: 1>, scalar_prefetch = 0 : i64, scratch_operands = 0 : i64, tpu.core_type = #tpu.core_type<tc>, window_params = [{transform_indices = @transform_0, window_bounds = array<i64: 8, 16, 128>}, {transform_indices = @transform_1, window_bounds = array<i64: 1, 1, 128>}, {pipeline_mode = #tpu.pipeline_mode<synchronous>, transform_indices = @transform_2, window_bounds = array<i64: 128, 128>}, {pipeline_mode = #tpu.pipeline_mode<synchronous>, transform_indices = @transform_3, window_bounds = array<i64: 1, 128>}, {pipeline_mode = #tpu.pipeline_mode<synchronous>, transform_indices = @transform_4, window_bounds = array<i64: 128, 128>}, {pipeline_mode = #tpu.pipeline_mode<synchronous>, transform_indices = @transform_5, window_bounds = array<i64: 1, 128>}, {pipeline_mode = #tpu.pipeline_mode<synchronous>, transform_indices = @transform_6, window_bounds = array<i64: 128, 128>}, {pipeline_mode = #tpu.pipeline_mode<synchronous>, transform_indices = @transform_7, window_bounds = array<i64: 1, 128>}, {pipeline_mode = #tpu.pipeline_mode<synchronous>, transform_indices = @transform_8, window_bounds = array<i64: 128, 128>}, {pipeline_mode = #tpu.pipeline_mode<synchronous>, transform_indices = @transform_9, window_bounds = array<i64: 1, 128>}, {transform_indices = @transform_10, window_bounds = array<i64: 8, 128>}]} {
    %c0 = arith.constant 0 : index
    %c0_0 = arith.constant 0 : index
    %c0_1 = arith.constant 0 : index
    %0 = vector.load %arg1[%c0, %c0_0, %c0_1] : memref<8x16x128xbf16, #tpu.memory_space<vmem>>, vector<8x16x128xbf16>
    %1 = vector.shape_cast %0 : vector<8x16x128xbf16> to vector<128x128xbf16>
    %c0_2 = arith.constant 0 : index
    %c0_3 = arith.constant 0 : index
    %2 = vector.load %arg3[%c0_2, %c0_3] : memref<128x128xbf16, #tpu.memory_space<vmem>>, vector<128x128xbf16>
    %cst = arith.constant dense<0.000000e+00> : vector<128x128xf32>
    %3 = tpu.matmul %1, %2, %cst {dimension_numbers = #tpu.dot_dimension_numbers<[1], [0], [0], [1], [0, 0, 1, 1], [], []>} : vector<128x128xbf16>, vector<128x128xbf16>, vector<128x128xf32> -> vector<128x128xf32>
    %c0_4 = arith.constant 0 : index
    %c0_5 = arith.constant 0 : index
    %4 = vector.load %arg4[%c0_4, %c0_5] : memref<1x128xf32, #tpu.memory_space<vmem>>, vector<1x128xf32>
    %5 = vector.broadcast %4 : vector<1x128xf32> to vector<128x128xf32>
    %6 = arith.addf %3, %5 : vector<128x128xf32>
    %7 = arith.negf %6 : vector<128x128xf32>
    %8 = math.exp %7 : vector<128x128xf32>
    %cst_6 = arith.constant 1.000000e+00 : f32
    %9 = vector.broadcast %cst_6 : f32 to vector<128x128xf32>
    %10 = arith.addf %9, %8 : vector<128x128xf32>
    %11 = arith.divf %9, %10 : vector<128x128xf32>
    %12 = arith.mulf %6, %11 : vector<128x128xf32>
    %13 = tpu.iota {dimensions = array<i32: 0>} : vector<8x128xi32>
    %14 = tpu.iota {dimensions = array<i32: 1>} : vector<8x128xi32>
    %c16_i32 = arith.constant 16 : i32
    %15 = vector.broadcast %c16_i32 : i32 to vector<8x128xi32>
    %16 = arith.muli %13, %15 : vector<8x128xi32>
    %17 = arith.cmpi sge, %14, %16 : vector<8x128xi32>
    %c16_i32_7 = arith.constant 16 : i32
    %18 = vector.broadcast %c16_i32_7 : i32 to vector<8x128xi32>
    %19 = arith.addi %16, %18 : vector<8x128xi32>
    %20 = arith.cmpi slt, %14, %19 : vector<8x128xi32>
    %21 = arith.andi %17, %20 : vector<8x128xi1>
    %c0_8 = arith.constant 0 : index
    %c0_9 = arith.constant 0 : index
    %c0_10 = arith.constant 0 : index
    %22 = vector.load %arg2[%c0_8, %c0_9, %c0_10] : memref<1x1x128xf32, #tpu.memory_space<vmem>>, vector<1x1x128xf32>
    %23 = vector.shape_cast %22 : vector<1x1x128xf32> to vector<1x128xf32>
    %cst_11 = arith.constant 0.000000e+00 : f32
    %24 = vector.shape_cast %23 : vector<1x128xf32> to vector<1x128xf32>
    %25 = vector.broadcast %24 : vector<1x128xf32> to vector<8x128xf32>
    %26 = vector.broadcast %cst_11 : f32 to vector<8x128xf32>
    %27 = arith.select %21, %25, %26 : vector<8x128xi1>, vector<8x128xf32>
    %28 = arith.truncf %27 : vector<8x128xf32> to vector<8x128xbf16>
    %29 = arith.truncf %12 : vector<128x128xf32> to vector<128x128xbf16>
    %cst_12 = arith.constant dense<0.000000e+00> : vector<8x128xf32>
    %30 = tpu.matmul %28, %29, %cst_12 {dimension_numbers = #tpu.dot_dimension_numbers<[1], [0], [0], [1], [0, 0, 1, 1], [], []>} : vector<8x128xbf16>, vector<128x128xbf16>, vector<8x128xf32> -> vector<8x128xf32>
    %cst_13 = arith.constant dense<0.000000e+00> : vector<8xf32>
    %31 = vector.multi_reduction <add>, %27, %cst_13 [1] : vector<8x128xf32> to vector<8xf32>
    %32 = vector.shape_cast %31 : vector<8xf32> to vector<8x1xf32>
    %c0_14 = arith.constant 0 : index
    %c0_15 = arith.constant 0 : index
    %33 = vector.load %arg5[%c0_14, %c0_15] : memref<128x128xf32, #tpu.memory_space<vmem>>, vector<128x128xf32>
    %cst_16 = arith.constant dense<0.000000e+00> : vector<8x128xf32>
    %34 = tpu.matmul %30, %33, %cst_16 {dimension_numbers = #tpu.dot_dimension_numbers<[1], [0], [0], [1], [0, 0, 1, 1], [], []>} : vector<8x128xf32>, vector<128x128xf32>, vector<8x128xf32> -> vector<8x128xf32>
    %c0_17 = arith.constant 0 : index
    %c0_18 = arith.constant 0 : index
    %35 = vector.load %arg6[%c0_17, %c0_18] : memref<1x128xf32, #tpu.memory_space<vmem>>, vector<1x128xf32>
    %36 = vector.broadcast %32 : vector<8x1xf32> to vector<8x128xf32>
    %37 = vector.broadcast %35 : vector<1x128xf32> to vector<8x128xf32>
    %38 = arith.mulf %36, %37 : vector<8x128xf32>
    %39 = arith.addf %34, %38 : vector<8x128xf32>
    %c0_19 = arith.constant 0 : index
    %c0_20 = arith.constant 0 : index
    %40 = vector.load %arg7[%c0_19, %c0_20] : memref<128x128xf32, #tpu.memory_space<vmem>>, vector<128x128xf32>
    %cst_21 = arith.constant dense<0.000000e+00> : vector<8x128xf32>
    %41 = tpu.matmul %39, %40, %cst_21 {dimension_numbers = #tpu.dot_dimension_numbers<[1], [0], [0], [1], [0, 0, 1, 1], [], []>} : vector<8x128xf32>, vector<128x128xf32>, vector<8x128xf32> -> vector<8x128xf32>
    %c0_22 = arith.constant 0 : index
    %c0_23 = arith.constant 0 : index
    %42 = vector.load %arg8[%c0_22, %c0_23] : memref<1x128xf32, #tpu.memory_space<vmem>>, vector<1x128xf32>
    %43 = vector.broadcast %42 : vector<1x128xf32> to vector<8x128xf32>
    %44 = arith.addf %41, %43 : vector<8x128xf32>
    %45 = arith.negf %44 : vector<8x128xf32>
    %46 = math.exp %45 : vector<8x128xf32>
    %cst_24 = arith.constant 1.000000e+00 : f32
    %47 = vector.broadcast %cst_24 : f32 to vector<8x128xf32>
    %48 = arith.addf %47, %46 : vector<8x128xf32>
    %49 = arith.divf %47, %48 : vector<8x128xf32>
    %50 = arith.mulf %44, %49 : vector<8x128xf32>
    %c0_25 = arith.constant 0 : index
    %c0_26 = arith.constant 0 : index
    %51 = vector.load %arg9[%c0_25, %c0_26] : memref<128x128xf32, #tpu.memory_space<vmem>>, vector<128x128xf32>
    %cst_27 = arith.constant dense<0.000000e+00> : vector<8x128xf32>
    %52 = tpu.matmul %50, %51, %cst_27 {dimension_numbers = #tpu.dot_dimension_numbers<[1], [0], [0], [1], [0, 0, 1, 1], [], []>} : vector<8x128xf32>, vector<128x128xf32>, vector<8x128xf32> -> vector<8x128xf32>
    %c0_28 = arith.constant 0 : index
    %c0_29 = arith.constant 0 : index
    %53 = vector.load %arg10[%c0_28, %c0_29] : memref<1x128xf32, #tpu.memory_space<vmem>>, vector<1x128xf32>
    %54 = vector.broadcast %53 : vector<1x128xf32> to vector<8x128xf32>
    %55 = arith.addf %52, %54 : vector<8x128xf32>
    %c0_30 = arith.constant 0 : index
    %c0_31 = arith.constant 0 : index
    %56 = vector.load %arg11[%c0_30, %c0_31] : memref<8x128xf32, #tpu.memory_space<vmem>>, vector<8x128xf32>
    tpu.vector_store %arg11[%c0_30, %c0_31], %55 {strides = array<i32>} : memref<8x128xf32, #tpu.memory_space<vmem>>, vector<8x128xf32>,
    return
  }
  func.func @transform_0(%arg0: i32) -> (i32, i32, i32) {
    %c0_i32 = arith.constant 0 : i32
    %c0_i32_0 = arith.constant 0 : i32
    %c0_i32_1 = arith.constant 0 : i32
    return %arg0, %c0_i32, %c0_i32_0 : i32, i32, i32
  }
  func.func @transform_1(%arg0: i32) -> (i32, i32, i32) {
    %c0_i32 = arith.constant 0 : i32
    %c0_i32_0 = arith.constant 0 : i32
    %c0_i32_1 = arith.constant 0 : i32
    return %arg0, %c0_i32, %c0_i32_0 : i32, i32, i32
  }
  func.func @transform_2(%arg0: i32) -> (i32, i32) {
    %c0_i32 = arith.constant 0 : i32
    %c0_i32_0 = arith.constant 0 : i32
    %c0_i32_1 = arith.constant 0 : i32
    return %c0_i32, %c0_i32_0 : i32, i32
  }
  func.func @transform_3(%arg0: i32) -> (i32, i32) {
    %c0_i32 = arith.constant 0 : i32
    %c0_i32_0 = arith.constant 0 : i32
    %c0_i32_1 = arith.constant 0 : i32
    return %c0_i32, %c0_i32_0 : i32, i32
  }
  func.func @transform_4(%arg0: i32) -> (i32, i32) {
    %c0_i32 = arith.constant 0 : i32
    %c0_i32_0 = arith.constant 0 : i32
    %c0_i32_1 = arith.constant 0 : i32
    return %c0_i32, %c0_i32_0 : i32, i32
  }
  func.func @transform_5(%arg0: i32) -> (i32, i32) {
    %c0_i32 = arith.constant 0 : i32
    %c0_i32_0 = arith.constant 0 : i32
    %c0_i32_1 = arith.constant 0 : i32
    return %c0_i32, %c0_i32_0 : i32, i32
  }
  func.func @transform_6(%arg0: i32) -> (i32, i32) {
    %c0_i32 = arith.constant 0 : i32
    %c0_i32_0 = arith.constant 0 : i32
    %c0_i32_1 = arith.constant 0 : i32
    return %c0_i32, %c0_i32_0 : i32, i32
  }
  func.func @transform_7(%arg0: i32) -> (i32, i32) {
    %c0_i32 = arith.constant 0 : i32
    %c0_i32_0 = arith.constant 0 : i32
    %c0_i32_1 = arith.constant 0 : i32
    return %c0_i32, %c0_i32_0 : i32, i32
  }
  func.func @transform_8(%arg0: i32) -> (i32, i32) {
    %c0_i32 = arith.constant 0 : i32
    %c0_i32_0 = arith.constant 0 : i32
    %c0_i32_1 = arith.constant 0 : i32
    return %c0_i32, %c0_i32_0 : i32, i32
  }
  func.func @transform_9(%arg0: i32) -> (i32, i32) {
    %c0_i32 = arith.constant 0 : i32
    %c0_i32_0 = arith.constant 0 : i32
    %c0_i32_1 = arith.constant 0 : i32
    return %c0_i32, %c0_i32_0 : i32, i32
  }
  func.func @transform_10(%arg0: i32) -> (i32, i32) {
    %c0_i32 = arith.constant 0 : i32
    %c0_i32_0 = arith.constant 0 : i32
    return %arg0, %c0_i32 : i32, i32
  }
}

</mosaic_0001>

<bundles_post_ra>
// kernel: tpu_custom_call.1
= control target key start
LH: loop header
LB: loop body
LE: loop exit
PB: predicated region body
PF: predicated region fallthrough
CT: control target
= control target key end

     0   :  { %15 = vsyncpa [#allocation3], 0  ;;  %s1560_s0 = inlined_call_operand.hbm [shape: bf16[8,16,128], index: 0, kind: input, shape index: {}]   ;;  %s1561_s1 = inlined_call_operand.vmem [shape: f32[1,1,128], index: 1, kind: input, shape index: {}]   ;;  %s1562_s2 = inlined_call_operand.hbm [shape: bf16[128,128], index: 2, kind: input, shape index: {}]   ;;  %s1563_s3 = inlined_call_operand.vmem [shape: f32[1,128], index: 3, kind: input, shape index: {}]   ;;  %s1564_s4 = inlined_call_operand.hbm [shape: f32[128,128], index: 4, kind: input, shape index: {}]   ;;  %s1565_s5 = inlined_call_operand.vmem [shape: f32[1,128], index: 5, kind: input, shape index: {}]   ;;  %s1566_s6 = inlined_call_operand.hbm [shape: f32[128,128], index: 6, kind: input, shape index: {}]   ;;  %s1567_s7 = inlined_call_operand.vmem [shape: f32[1,128], index: 7, kind: input, shape index: {}]   ;;  %s1568_s8 = inlined_call_operand.hbm [shape: f32[128,128], index: 8, kind: input, shape index: {}]   ;;  %s1569_s9 = inlined_call_operand.vmem [shape: f32[1,128], index: 9, kind: input, shape index: {}]   ;;  %s1570_s10 = inlined_call_operand.hbm [shape: f32[8,128], index: 10, kind: output, shape index: {}]  }
   0x1   :  { %16 = vsyncpa [#allocation6], 0 }
   0x2   :  { %17 = vsyncpa [#allocation9], 0 }
   0x3   :  { %18 = vsyncpa [#allocation4], 0  ;;  %s1320_s13 = smov [#allocation5]  }
   0x4   :  { %s38_s14 = sshll.u32 %s1320_s13, 4  ;;  %s39_s14 = int_to_ptr.vmem [resolvable:$true] %s38_s14 }
   0x5   :  { %s1200_s15 = scalar_lea.vmem %s39_s14, 1024  ;;  %p1205_p1 = scmp.lt.s32.totalorder %s39_s14, %s39_s14 }
   0x6   :  { %p1201_p0 = scmp.ne.s32.totalorder %s39_s14, %s1200_s15  ;;  %p1206_p2 = scmp.lt.s32.totalorder %s1200_s15, %s1200_s15 }
   0x8   :  { %p1207_p3 = por %p1206_p2, %p1205_p1 }
   0xa   :  { %p1208_p4 = pnand %p1207_p3, %p1201_p0 }
   0xc   :  { %1211 = shalt.err (!%p1208_p4)
}
   0xd   :  { %s1321_s16 = smov 64   ;;  %s1322_s17 = smov 4  }
   0xe   :  { %44 = dma.hbm_to_vmem [thread:$0]  %s1562_s2, 1024, %s39_s14, [#allocation6], %s1321_s16, %s1321_s16, %s1322_s17  }
   0xf   :  { %s1323_s20 = smov [#allocation8]   ;;  %s1324_s22 = smov [#allocation2]  }
  0x10   :  { %s66_s21 = sshll.u32 %s1323_s20, 4  ;;  %s24_s23 = sshll.u32 %s1324_s22, 4  ;;  %s67_s21 = int_to_ptr.vmem [resolvable:$true] %s66_s21  ;;  %s25_s23 = int_to_ptr.vmem [resolvable:$true] %s24_s23 }
  0x11   :  { %s1220_s24 = scalar_lea.vmem %s67_s21, 2048  ;;  %p1225_p6 = scmp.lt.s32.totalorder %s67_s21, %s67_s21 }
  0x12   :  { %p1221_p5 = scmp.ne.s32.totalorder %s67_s21, %s1220_s24  ;;  %p1226_p7 = scmp.lt.s32.totalorder %s1220_s24, %s1220_s24 }
  0x14   :  { %p1227_p8 = por %p1226_p7, %p1225_p6 }
  0x16   :  { %p1228_p9 = pnand %p1227_p8, %p1221_p5 }
  0x18   :  { %1231 = shalt.err (!%p1228_p9)
}
  0x19   :  { %s1325_s25 = smov 128   ;;  %s1326_s26 = smov 8  }
  0x1a   :  { %72 = dma.hbm_to_vmem [thread:$0]  %s1566_s6, 2048, %s67_s21, [#allocation9], %s1325_s25, %s1325_s25, %s1326_s26  }
  0x1b   :  { %s1240_s2 = scalar_lea.vmem %s25_s23, 1024  ;;  %p1245_p11 = scmp.lt.s32.totalorder %s25_s23, %s25_s23 }
  0x1c   :  { %p1241_p10 = scmp.ne.s32.totalorder %s25_s23, %s1240_s2  ;;  %p1246_p12 = scmp.lt.s32.totalorder %s1240_s2, %s1240_s2 }
  0x1e   :  { %p1247_p13 = por %p1246_p12, %p1245_p11 }
  0x20   :  { %p1248_p0 = pnand %p1247_p13, %p1241_p10 }
  0x22   :  { %1251 = shalt.err (!%p1248_p0)
}
  0x23   :  { %30 = dma.hbm_to_vmem [thread:$0]  %s1560_s0, 1024, %s25_s23, [#allocation3], %s1321_s16, %s1321_s16, %s1322_s17  }
  0x24   :  { %s1327_s11 = smov [#allocation7]   ;;  %s1328_s13 = smov [#allocation10]  }
  0x25   :  { %s52_s12 = sshll.u32 %s1327_s11, 4  ;;  %s80_s14 = sshll.u32 %s1328_s13, 4  ;;  %s53_s12 = int_to_ptr.vmem [resolvable:$true] %s52_s12  ;;  %s81_s14 = int_to_ptr.vmem [resolvable:$true] %s80_s14 }
  0x26   :  { %s1260_s15 = scalar_lea.vmem %s53_s12, 2048  ;;  %p1265_p2 = scmp.lt.s32.totalorder %s53_s12, %s53_s12 }
  0x27   :  { %p1261_p1 = scmp.ne.s32.totalorder %s53_s12, %s1260_s15  ;;  %p1266_p3 = scmp.lt.s32.totalorder %s1260_s15, %s1260_s15 }
  0x29   :  { %p1267_p4 = por %p1266_p3, %p1265_p2 }
  0x2b   :  { %p1268_p5 = pnand %p1267_p4, %p1261_p1 }
  0x2d   :  { %1271 = shalt.err (!%p1268_p5)
}
  0x2e   :  { %58 = dma.hbm_to_vmem [thread:$0]  %s1564_s4, 2048, %s53_s12, [#allocation6], %s1325_s25, %s1325_s25, %s1326_s26  }
  0x2f   :  { %s1280_s0 = scalar_lea.vmem %s81_s14, 2048  ;;  %p1285_p7 = scmp.lt.s32.totalorder %s81_s14, %s81_s14 }
  0x30   :  { %p1281_p6 = scmp.ne.s32.totalorder %s81_s14, %s1280_s0  ;;  %p1286_p8 = scmp.lt.s32.totalorder %s1280_s0, %s1280_s0 }
  0x32   :  { %p1287_p9 = por %p1286_p8, %p1285_p7 }
  0x34   :  { %p1288_p10 = pnand %p1287_p9, %p1281_p6 }
  0x36   :  { %1291 = shalt.err (!%p1288_p10)
}
  0x37   :  { %86 = dma.hbm_to_vmem [thread:$0]  %s1568_s8, 2048, %s81_s14, [#allocation9], %s1325_s25, %s1325_s25, %s1326_s26  }
  0x38   :  { %1312 = dma.done.wait [#allocation3], 1024  }
  0x39   :  { %1313 = vsyncadd [#allocation3], 4294966272 }
  0x3a   :  { %1314 = dma.done.wait [#allocation6], 3072  }
  0x3b   :  { %1315 = vsyncadd [#allocation6], 4294964224 }
  0x3c   :  { %1316 = dma.done.wait [#allocation9], 4096  }
  0x3d   :  { %1317 = vsyncadd [#allocation9], 4294963200  ;;  %v1108_v0 = vld [vmem:[#allocation5 + $0x38] sm:$0xff]   ;;  %v1109_v1 = vld [vmem:[#allocation5 + $0x30] sm:$0xff]   ;;  %v1329_v16 = vmov 0.0   ;;  %vm1330_vm0 = vmmov 0  }
  0x3e   :  { %939 = vmatprep.subr.bf16.mxu0 %v1108_v0  ;;  %v1110_v2 = vld [vmem:[#allocation5 + $0x28] sm:$0xff]   ;;  %v1111_v3 = vld [vmem:[#allocation5 + $0x20] sm:$0xff]   ;;  %v1112_v5 = vld [vmem:[#allocation5 + $0x18] sm:$0xff]   ;;  %971 = vmatprep.subr.bf16.mxu1 %v1329_v16  ;;  %s1331_s24 = smov [#allocation11]  }
  0x3f   :  { %940 = vmatpush3.bf16.msra.mxu0 %v1108_v0  ;;  %v1116_v4 = vld [vmem:[#allocation2] sm:$0xff]   ;;  %v1113_v6 = vld [vmem:[#allocation5 + $0x10] sm:$0xff]   ;;  %v1114_v7 = vld [vmem:[#allocation5 + $0x8] sm:$0xff]   ;;  %987 = vmatprep.mubr.msk.bf16.mxu1 %vm1330_vm0, %v1329_v16  ;;  %s811_s25 = sshll.u32 %s1331_s24, 4  ;;  %s812_s25 = int_to_ptr.vmem [resolvable:$true] %s811_s25 }
  0x40   :  { %941 = vmatprep.subr.bf16.mxu0 %v1109_v1  ;;  %955 = vmatprep.mubr.bf16.mxu0 %v1116_v4  ;;  %v1115_v8 = vld [vmem:[#allocation5] sm:$0xff]   ;;  %v1117_v9 = vld [vmem:[#allocation2 + $0x8] sm:$0xff]   ;;  %v1118_v10 = vld [vmem:[#allocation2 + $0x10] sm:$0xff]   ;;  %p1297_p12 = scmp.lt.s32.totalorder %s812_s25, %s812_s25 }
  0x41   :  { %v1119_v11 = vld [vmem:[#allocation2 + $0x18] sm:$0xff]   ;;  %v1120_v12 = vld [vmem:[#allocation2 + $0x20] sm:$0xff]   ;;  %v1121_v13 = vld [vmem:[#allocation2 + $0x28] sm:$0xff]  }
  0x42   :  { %v1122_v14 = vld [vmem:[#allocation2 + $0x30] sm:$0xff]   ;;  %v1123_v15 = vld [vmem:[#allocation2 + $0x38] sm:$0xff]   ;;  %v530_v19 = vld [vmem:[#allocation7 + $0x68] sm:$0xff] }
  0x43   :  { %942 = vmatpush3.bf16.msra.mxu0 %v1109_v1  ;;  %v532_v17 = vld [vmem:[#allocation7 + $0x78] sm:$0xff]  ;;  %v531_v18 = vld [vmem:[#allocation7 + $0x70] sm:$0xff]  ;;  %v529_v20 = vld [vmem:[#allocation7 + $0x60] sm:$0xff] }
  0x44   :  { %943 = vmatprep.subr.bf16.mxu0 %v1110_v2  ;;  %v528_v21 = vld [vmem:[#allocation7 + $0x58] sm:$0xff]  ;;  %v527_v22 = vld [vmem:[#allocation7 + $0x50] sm:$0xff]  ;;  %v526_v23 = vld [vmem:[#allocation7 + $0x48] sm:$0xff] }
  0x45   :  { %v525_v24 = vld [vmem:[#allocation7 + $0x40] sm:$0xff]  ;;  %v524_v25 = vld [vmem:[#allocation7 + $0x38] sm:$0xff]  ;;  %v523_v26 = vld [vmem:[#allocation7 + $0x30] sm:$0xff] }
  0x46   :  { %v522_v27 = vld [vmem:[#allocation7 + $0x28] sm:$0xff]  ;;  %v521_v28 = vld [vmem:[#allocation7 + $0x20] sm:$0xff]  ;;  %v520_v29 = vld [vmem:[#allocation7 + $0x18] sm:$0xff] }
  0x47   :  { %944 = vmatpush3.bf16.msra.mxu0 %v1110_v2  ;;  %v519_v30 = vld [vmem:[#allocation7 + $0x10] sm:$0xff]  ;;  %v518_v31 = vld [vmem:[#allocation7 + $0x8] sm:$0xff]  ;;  %v517_v32 = vld [vmem:[#allocation7] sm:$0xff] }
  0x48   :  { %945 = vmatprep.subr.bf16.mxu0 %v1111_v3  ;;  %v822_v45 = vld [vmem:[%s1563_s3] ss:$0 sm:$0xff] }
  0x4b   :  { %946 = vmatpush3.bf16.msra.mxu0 %v1111_v3 }
  0x4c   :  { %947 = vmatprep.subr.bf16.mxu0 %v1112_v5 }
  0x4f   :  { %948 = vmatpush3.bf16.msra.mxu0 %v1112_v5 }
  0x50   :  { %949 = vmatprep.subr.bf16.mxu0 %v1113_v6 }
  0x53   :  { %950 = vmatpush3.bf16.msra.mxu0 %v1113_v6 }
  0x54   :  { %951 = vmatprep.subr.bf16.mxu0 %v1114_v7 }
  0x57   :  { %952 = vmatpush3.bf16.msra.mxu0 %v1114_v7 }
  0x58   :  { %953 = vmatprep.subr.bf16.mxu0 %v1115_v8 }
  0x5b   :  { %954 = vmatpush3.bf16.msra.mxu0 %v1115_v8 }
  0x5c   :  { %991 = vmatprep.subr.mxu0 %v1329_v16 }
  0x5e   :  { %956 = vmatmul.mubr.bf16.vlgmr.msra.gmra.mxu0 %v1117_v9 }
  0x5f   :  { %959 = vmatprep.mubr.bf16.mxu0 %v1118_v10  ;;  %992 = vmatpush3.msra.mxu0 %v532_v17 }
  0x60   :  { %993 = vmatprep.subr.mxu0 %v1329_v16 }
  0x61   :  { %994 = vmatpush3.msra.mxu0 %v531_v18 }
  0x62   :  { %995 = vmatprep.subr.mxu0 %v1329_v16 }
  0x63   :  { %996 = vmatpush3.msra.mxu0 %v530_v19 }
  0x64   :  { %997 = vmatprep.subr.mxu0 %v1329_v16 }
  0x65   :  { %998 = vmatpush3.msra.mxu0 %v529_v20 }
  0x66   :  { %960 = vmatmul.mubr.bf16.gmra.mxu0 %v1119_v11  ;;  %999 = vmatprep.subr.mxu0 %v1329_v16 }
  0x67   :  { %963 = vmatprep.mubr.bf16.mxu0 %v1120_v12  ;;  %1000 = vmatpush3.msra.mxu0 %v528_v21 }
  0x68   :  { %1001 = vmatprep.subr.mxu0 %v1329_v16 }
  0x69   :  { %1002 = vmatpush3.msra.mxu0 %v527_v22 }
  0x6a   :  { %1003 = vmatprep.subr.mxu0 %v1329_v16 }
  0x6b   :  { %1004 = vmatpush3.msra.mxu0 %v526_v23 }
  0x6c   :  { %1005 = vmatprep.subr.mxu0 %v1329_v16 }
  0x6d   :  { %1006 = vmatpush3.msra.mxu0 %v525_v24 }
  0x6e   :  { %964 = vmatmul.mubr.bf16.gmra.mxu0 %v1121_v13  ;;  %1007 = vmatprep.subr.mxu0 %v1329_v16 }
  0x6f   :  { %967 = vmatprep.mubr.bf16.mxu0 %v1122_v14  ;;  %1008 = vmatpush3.msra.mxu0 %v524_v25 }
  0x70   :  { %1009 = vmatprep.subr.mxu0 %v1329_v16 }
  0x71   :  { %1010 = vmatpush3.msra.mxu0 %v523_v26 }
  0x72   :  { %1011 = vmatprep.subr.mxu0 %v1329_v16 }
  0x73   :  { %1012 = vmatpush3.msra.mxu0 %v522_v27 }
  0x74   :  { %1013 = vmatprep.subr.mxu0 %v1329_v16 }
  0x75   :  { %1014 = vmatpush3.msra.mxu0 %v521_v28 }
  0x76   :  { %968 = vmatmul.mubr.bf16.gmra.mxu0 %v1123_v15  ;;  %1015 = vmatprep.subr.mxu0 %v1329_v16 }
  0x77   :  { %1023 = vmatprep.mubr.msk.f32.mxu0 %vm1330_vm0, %v1329_v16  ;;  %1016 = vmatpush3.msra.mxu0 %v520_v29 }
  0x78   :  { %1017 = vmatprep.subr.mxu0 %v1329_v16 }
  0x79   :  { %1018 = vmatpush3.msra.mxu0 %v519_v30 }
  0x7a   :  { %1019 = vmatprep.subr.mxu0 %v1329_v16 }
  0x7b   :  { %1020 = vmatpush3.msra.mxu0 %v518_v31 }
  0x7c   :  { %1021 = vmatprep.subr.mxu0 %v1329_v16 }
  0x7d   :  { %1022 = vmatpush3.msra.mxu0 %v517_v32 }
  0x7e   :  { %1061 = vmatprep.subr.mxu0 %v1329_v16 }
 0x11e   :  { %v957_v33 = vpop.f32.mrf.mxu0 }
 0x11f   :  { %v1466_v4 = vadd.f32 %v957_v33, %v822_v45 }
 0x120   :  { %v1432_v34 = vpop.f32.mrf.mxu0 }
 0x121   :  { %v841_v9 = vmul.f32 -1.442695, %v1466_v4  ;;  %v1483_v21 = vadd.f32 %v822_v45, %v1432_v34 }
 0x122   :  { %v958_v35 = vpop.f32.mrf.mxu0 }
 0x123   :  { %v1475_v10 = vadd.f32 %v958_v35, %v822_v45  ;;  %v839_v30 = vmul.f32 -1.442695, %v1483_v21 }
 0x124   :  { %v277_v36 = vpop.f32.mrf.mxu0 }
 0x125   :  { %v842_v17 = vmul.f32 -1.442695, %v1475_v10  ;;  %v1480_v18 = vadd.f32 %v822_v45, %v277_v36 }
 0x126   :  { %v961_v37 = vpop.f32.mrf.mxu0 }
 0x127   :  { %v1463_v2 = vadd.f32 %v961_v37, %v822_v45  ;;  %v840_v26 = vmul.f32 -1.442695, %v1480_v18 }
 0x128   :  { %v290_v38 = vpop.f32.mrf.mxu0 }
 0x129   :  { %v1471_v7 = vadd.f32 %v822_v45, %v290_v38  ;;  %v845_v8 = vmul.f32 -1.442695, %v1463_v2 }
 0x12a   :  { %v962_v39 = vpop.f32.mrf.mxu0 }
 0x12b   :  { %v1460_v0 = vadd.f32 %v962_v39, %v822_v45  ;;  %v843_v13 = vmul.f32 -1.442695, %v1471_v7 }
 0x12c   :  { %v293_v40 = vpop.f32.mrf.mxu0 }
 0x12d   :  { %v846_v5 = vmul.f32 -1.442695, %v1460_v0  ;;  %v1469_v6 = vadd.f32 %v822_v45, %v293_v40 }
 0x12e   :  { %v965_v41 = vpop.f32.mrf.mxu0 }
 0x12f   :  { %v1442_v50 = vadd.f32 %v965_v41, %v822_v45  ;;  %v844_v11 = vmul.f32 -1.442695, %v1469_v6 }
 0x130   :  { %v306_v42 = vpop.f32.mrf.mxu0 }
 0x131   :  { %v849_v59 = vmul.f32 -1.442695, %v1442_v50  ;;  %v1457_v62 = vadd.f32 %v822_v45, %v306_v42 }
 0x132   :  { %v966_v43 = vpop.f32.mrf.mxu0 }
 0x133   :  { %v1438_v47 = vadd.f32 %v966_v43, %v822_v45  ;;  %v847_v3 = vmul.f32 -1.442695, %v1457_v62 }
 0x134   :  { %v309_v44 = vpop.f32.mrf.mxu0 }
 0x135   :  { %v850_v54 = vmul.f32 -1.442695, %v1438_v47  ;;  %v1451_v57 = vadd.f32 %v822_v45, %v309_v44 }
 0x136   :  { %v969_v46 = vpop.f32.mrf.mxu0 }
 0x137   :  { %v1440_v48 = vadd.f32 %v969_v46, %v822_v45  ;;  %v848_v1 = vmul.f32 -1.442695, %v1451_v57 }
 0x138   :  { %v322_v49 = vpop.f32.mrf.mxu0 }
 0x139   :  { %v853_v51 = vmul.f32 -1.442695, %v1440_v48  ;;  %v1445_v52 = vadd.f32 %v822_v45, %v322_v49 }
 0x13a   :  { %v970_v53 = vpop.f32.mrf.mxu0 }
 0x13b   :  { %v851_v55 = vmul.f32 -1.442695, %v1445_v52  ;;  %v1449_v56 = vadd.f32 %v970_v53, %v822_v45  ;;  %1124 = vpow2.f32 %v853_v51 }
 0x13c   :  { %v325_v58 = vpop.f32.mrf.mxu0 }
 0x13d   :  { %v854_v60 = vmul.f32 -1.442695, %v1449_v56  ;;  %v1455_v61 = vadd.f32 %v822_v45, %v325_v58  ;;  %1126 = vpow2.f32 %v851_v55 }
 0x13e   :  { %1128 = vpow2.f32 %v850_v54 }
 0x13f   :  { %v852_v63 = vmul.f32 -1.442695, %v1455_v61  ;;  %1130 = vpow2.f32 %v854_v60 }
 0x140   :  { %1132 = vpow2.f32 %v849_v59 }
 0x141   :  { %1134 = vpow2.f32 %v852_v63 }
 0x142   :  { %1136 = vpow2.f32 %v848_v1 }
 0x143   :  { %1138 = vpow2.f32 %v847_v3 }
 0x144   :  { %1140 = vpow2.f32 %v846_v5 }
 0x145   :  { %1142 = vpow2.f32 %v845_v8 }
 0x146   :  { %1144 = vpow2.f32 %v841_v9 }
 0x147   :  { %1146 = vpow2.f32 %v844_v11 }
 0x148   :  { %v1125_v12 = vpop.eup %1124  ;;  %1148 = vpow2.f32 %v843_v13 }
 0x149   :  { %v399_v14 = vadd.f32 1.0, %v1125_v12 }
 0x14a   :  { %v1127_v15 = vpop.eup %1126 }
 0x14b   :  { %v1129_v19 = vpop.eup %1128  ;;  %v397_v22 = vadd.f32 1.0, %v1127_v15  ;;  %1150 = vrcp.f32 %v399_v14  ;;  %v449_v15 = vlaneseq }
 0x14c   :  { %v1131_v20 = vpop.eup %1130  ;;  %1152 = vpow2.f32 %v842_v17  ;;  %v396_v27 = vadd.f32 1.0, %v1129_v19 }
 0x14d   :  { %v1133_v23 = vpop.eup %1132  ;;  %v400_v24 = vadd.f32 1.0, %v1131_v20 }
 0x14e   :  { %v1135_v25 = vpop.eup %1134  ;;  %v395_v31 = vadd.f32 1.0, %v1133_v23 }
 0x14f   :  { %1154 = vrcp.f32 %v400_v24  ;;  %v398_v28 = vadd.f32 1.0, %v1135_v25  ;;  %v1137_v29 = vpop.eup %1136 }
 0x150   :  { %1156 = vrcp.f32 %v397_v22  ;;  %v1139_v32 = vpop.eup %1138  ;;  %v394_v33 = vadd.f32 1.0, %v1137_v29  ;;  %v450_v22 = vshrl.u32 %v449_v15, 7 }
 0x151   :  { %1158 = vrcp.f32 %v398_v28  ;;  %v1141_v34 = vpop.eup %1140  ;;  %v393_v35 = vadd.f32 1.0, %v1139_v32 }
 0x152   :  { %1160 = vpow2.f32 %v840_v26  ;;  %v1143_v36 = vpop.eup %1142  ;;  %v392_v38 = vadd.f32 1.0, %v1141_v34 }
 0x153   :  { %1162 = vrcp.f32 %v396_v27  ;;  %v1145_v37 = vpop.eup %1144  ;;  %v391_v41 = vadd.f32 1.0, %v1143_v36  ;;  %v453_v27 = vmul.u32 16, %v450_v22  ;;  %v713_v22 = vld [vmem:[#allocation10 + $0x10] sm:$0xff] }
 0x154   :  { %1164 = vpow2.f32 %v839_v30  ;;  %v1147_v39 = vpop.eup %1146  ;;  %v387_v3 = vadd.f32 1.0, %v1145_v37  ;;  %v625_v37 = vld [vmem:[#allocation8 + $0x70] sm:$0xff] }
 0x155   :  { %1166 = vrcp.f32 %v395_v31  ;;  %v1149_v40 = vpop.eup %1148  ;;  %v390_v44 = vadd.f32 1.0, %v1147_v39  ;;  %v452_v31 = vand.u32 127, %v449_v15  ;;  %v623_v39 = vld [vmem:[#allocation8 + $0x60] sm:$0xff] }
 0x156   :  { %1168 = vrcp.f32 %v394_v33  ;;  %v389_v49 = vadd.f32 1.0, %v1149_v40  ;;  %v622_v40 = vld [vmem:[#allocation8 + $0x58] sm:$0xff]  ;;  %v719_v15 = vld [vmem:[#allocation10 + $0x40] sm:$0xff] }
 0x157   :  { %1170 = vrcp.f32 %v393_v35  ;;  %vm454_vm1 = vcmp.ge.s32.totalorder %v452_v31, %v453_v27 }
 0x158   :  { %v1151_v42 = vpop.eup %1150  ;;  %1172 = vrcp.f32 %v392_v38  ;;  %v624_v38 = vld [vmem:[#allocation8 + $0x68] sm:$0xff] }
 0x159   :  { %v1153_v43 = vpop.eup %1152  ;;  %1174 = vrcp.f32 %v391_v41  ;;  %v447_v51 = vmul.f32 %v1151_v42, %v1440_v48  ;;  %v621_v41 = vld [vmem:[#allocation8 + $0x50] sm:$0xff]  ;;  %v620_v42 = vld [vmem:[#allocation8 + $0x48] sm:$0xff] }
 0x15a   :  { %v388_v58 = vadd.f32 1.0, %v1153_v43  ;;  %1176 = vrcp.f32 %v390_v44  ;;  %v619_v43 = vld [vmem:[#allocation8 + $0x40] sm:$0xff]  ;;  %v618_v44 = vld [vmem:[#allocation8 + $0x38] sm:$0xff] }
 0x15b   :  { %1178 = vrcp.f32 %v389_v49  ;;  %v615_v49 = vld [vmem:[#allocation8 + $0x20] sm:$0xff] }
 0x15c   :  { %v1155_v45 = vpop.eup %1154  ;;  %1180 = vrcp.f32 %v388_v58 }
 0x15d   :  { %v1157_v46 = vpop.eup %1156  ;;  %v448_v53 = vmul.f32 %v1155_v45, %v1449_v56  ;;  %1182 = vrcp.f32 %v387_v3  ;;  %v617_v45 = vld [vmem:[#allocation8 + $0x30] sm:$0xff]  ;;  %v859_v3 = vld [vmem:[%s1565_s5] ss:$0 sm:$0xff] }
 0x15e   :  { %v1159_v54 = vpop.eup %1158  ;;  %v445_v5 = vmul.f32 %v1157_v46, %v1445_v52  ;;  %v616_v46 = vld [vmem:[#allocation8 + $0x28] sm:$0xff] }
 0x15f   :  { %v1161_v55 = vpop.eup %1160  ;;  %v446_v59 = vmul.f32 %v1159_v54, %v1455_v61  ;;  %v474_v60 = vpack.c.bf16 %v448_v53, %v447_v51  ;;  %v614_v51 = vld [vmem:[#allocation8 + $0x18] sm:$0xff]  ;;  %v613_v53 = vld [vmem:[#allocation8 + $0x10] sm:$0xff] }
 0x160   :  { %v1163_v63 = vpop.eup %1162  ;;  %v386_v48 = vadd.f32 1.0, %v1161_v55 }
 0x161   :  { %v1165_v1 = vpop.eup %1164  ;;  %972 = vmatpush3.bf16.msra.mxu1 %v474_v60  ;;  %v444_v56 = vmul.f32 %v1163_v63, %v1438_v47  ;;  %v473_v9 = vpack.c.bf16 %v446_v59, %v445_v5  ;;  %v612_v60 = vld [vmem:[#allocation8 + $0x8] sm:$0xff]  ;;  %v611_v63 = vld [vmem:[#allocation8] sm:$0xff] }
 0x162   :  { %v1167_v8 = vpop.eup %1166  ;;  %973 = vmatprep.subr.bf16.mxu1 %v1329_v16  ;;  %v385_v12 = vadd.f32 1.0, %v1165_v1  ;;  %1184 = vrcp.f32 %v386_v48 }
 0x163   :  { %v1169_v11 = vpop.eup %1168  ;;  %v443_v61 = vmul.f32 %v1167_v8, %v1442_v50 }
 0x164   :  { %v1171_v13 = vpop.eup %1170  ;;  %v442_v52 = vmul.f32 %v1169_v11, %v1451_v57  ;;  %1186 = vrcp.f32 %v385_v12  ;;  %v725_v11 = vld [vmem:[#allocation10 + $0x70] sm:$0xff]  ;;  %v724_v12 = vld [vmem:[#allocation10 + $0x68] sm:$0xff] }
 0x165   :  { %974 = vmatpush3.bf16.msra.mxu1 %v473_v9  ;;  %v472_v14 = vpack.c.bf16 %v444_v56, %v443_v61  ;;  %v1173_v17 = vpop.eup %1172  ;;  %v441_v19 = vmul.f32 %v1171_v13, %v1457_v62  ;;  %v726_v9 = vld [vmem:[#allocation10 + $0x78] sm:$0xff]  ;;  %v723_v61 = vld [vmem:[#allocation10 + $0x60] sm:$0xff] }
 0x166   :  { %975 = vmatprep.subr.bf16.mxu1 %v1329_v16  ;;  %v1175_v47 = vpop.eup %1174  ;;  %v440_v20 = vmul.f32 %v1173_v17, %v1460_v0  ;;  %v722_v13 = vld [vmem:[#allocation10 + $0x58] sm:$0xff] }
 0x167   :  { %v471_v50 = vpack.c.bf16 %v442_v52, %v441_v19  ;;  %v1177_v23 = vpop.eup %1176  ;;  %v439_v24 = vmul.f32 %v1175_v47, %v1463_v2  ;;  %v455_v2 = vadd.s32 16, %v453_v27  ;;  %v721_v52 = vld [vmem:[#allocation10 + $0x50] sm:$0xff]  ;;  %v718_v17 = vld [vmem:[#allocation10 + $0x38] sm:$0xff]  ;;  %v716_v47 = vld [vmem:[#allocation10 + $0x28] sm:$0xff] }
 0x168   :  { %v1179_v25 = vpop.eup %1178  ;;  %v438_v57 = vmul.f32 %v1177_v23, %v1469_v6  ;;  %v717_v19 = vld [vmem:[#allocation10 + $0x30] sm:$0xff]  ;;  %v712_v23 = vld [vmem:[#allocation10 + $0x8] sm:$0xff] }
 0x169   :  { %976 = vmatpush3.bf16.msra.mxu1 %v472_v14  ;;  %v470_v26 = vpack.c.bf16 %v440_v20, %v439_v24  ;;  %v1181_v62 = vpop.eup %1180  ;;  %v437_v28 = vmul.f32 %v1179_v25, %v1471_v7  ;;  %vm456_vm2 = vcmp.lt.s32.totalorder %v452_v31, %v455_v2  ;;  %v720_v14 = vld [vmem:[#allocation10 + $0x48] sm:$0xff]  ;;  %v715_v20 = vld [vmem:[#allocation10 + $0x20] sm:$0xff] }
 0x16a   :  { %977 = vmatprep.subr.bf16.mxu1 %v1329_v16  ;;  %v1183_v29 = vpop.eup %1182  ;;  %v436_v0 = vmul.f32 %v1181_v62, %v1475_v10  ;;  %v855_v10 = vld [vmem:[%s1561_s1] ss:$0 sm:$0xff]  ;;  %vm457_vm3 = vmand %vm454_vm1, %vm456_vm2 }
 0x16b   :  { %v469_v30 = vpack.c.bf16 %v438_v57, %v437_v28  ;;  %v435_v33 = vmul.f32 %v1183_v29, %v1466_v4  ;;  %v857_v36 = vpack.c.bf16 %v855_v10, %v855_v10  ;;  %vm856_vm4 = vmpackc.low %vm457_vm3, %vm457_vm3  ;;  %v711_v24 = vld [vmem:[#allocation10] sm:$0xff] }
 0x16c   :  { %v860_v25 = vld [vmem:[%s1567_s7] ss:$0 sm:$0xff]  ;;  %s1292_s7 = scalar_lea.vmem %s812_s25, 128 }
 0x16d   :  { %978 = vmatpush3.bf16.msra.mxu1 %v471_v50  ;;  %v468_v35 = vpack.c.bf16 %v436_v0, %v435_v33  ;;  %v714_v50 = vld [vmem:[#allocation10 + $0x18] sm:$0xff]  ;;  %p1293_p11 = scmp.ne.s32.totalorder %s812_s25, %s1292_s7  ;;  %p1298_p13 = scmp.lt.s32.totalorder %s1292_s7, %s1292_s7 }
 0x16e   :  { %979 = vmatprep.subr.bf16.mxu1 %v1329_v16 }
 0x16f   :  { %v1185_v32 = vpop.eup %1184  ;;  %p1299_p0 = por %p1298_p13, %p1297_p12 }
 0x170   :  { %v434_v6 = vmul.f32 %v1185_v32, %v1480_v18  ;;  %v465_v18 = vsel %vm457_vm3, %v855_v10, 0.0 }
 0x171   :  { %980 = vmatpush3.bf16.msra.mxu1 %v470_v26  ;;  %v1187_v34 = vpop.eup %1186  ;;  %515 = vadd.xlane.f32.xlu0 %v465_v18  ;;  %p1300_p1 = pnand %p1299_p0, %p1293_p11 }
 0x172   :  { %981 = vmatprep.subr.bf16.mxu1 %v1329_v16  ;;  %v433_v7 = vmul.f32 %v1187_v34, %v1483_v21  ;;  %v626_v21 = vld [vmem:[#allocation8 + $0x78] sm:$0xff] }
 0x174   :  { %v467_v4 = vpack.c.bf16 %v434_v6, %v433_v7 }
 0x175   :  { %982 = vmatpush3.bf16.msra.mxu1 %v469_v30 }
 0x176   :  { %983 = vmatprep.subr.bf16.mxu1 %v1329_v16 }
 0x179   :  { %984 = vmatpush3.bf16.msra.mxu1 %v468_v35 }
 0x17a   :  { %985 = vmatprep.subr.bf16.mxu1 %v1329_v16 }
 0x17d   :  { %986 = vmatpush3.bf16.msra.mxu1 %v467_v4 }
 0x17e   :  { %1026 = vmatprep.subr.mxu1 %v1329_v16 }
 0x180   :  { %988 = vmatmul.mubr.msk.bf16.vlgmr.msra.gmra.mxu1 %vm856_vm4, %v857_v36 }
 0x181   :  { %1058 = vmatprep.mubr.msk.f32.mxu1 %vm1330_vm0, %v1329_v16  ;;  %1027 = vmatpush3.msra.mxu1 %v626_v21 }
 0x182   :  { %1028 = vmatprep.subr.mxu1 %v1329_v16 }
 0x183   :  { %1029 = vmatpush3.msra.mxu1 %v625_v37 }
 0x184   :  { %1030 = vmatprep.subr.mxu1 %v1329_v16 }
 0x185   :  { %1031 = vmatpush3.msra.mxu1 %v624_v38 }
 0x186   :  { %1032 = vmatprep.subr.mxu1 %v1329_v16 }
 0x187   :  { %1033 = vmatpush3.msra.mxu1 %v623_v39 }
 0x188   :  { %1034 = vmatprep.subr.mxu1 %v1329_v16 }
 0x189   :  { %1035 = vmatpush3.msra.mxu1 %v622_v40 }
 0x18a   :  { %1036 = vmatprep.subr.mxu1 %v1329_v16 }
 0x18b   :  { %1037 = vmatpush3.msra.mxu1 %v621_v41 }
 0x18c   :  { %1038 = vmatprep.subr.mxu1 %v1329_v16 }
 0x18d   :  { %1039 = vmatpush3.msra.mxu1 %v620_v42 }
 0x18e   :  { %1040 = vmatprep.subr.mxu1 %v1329_v16 }
 0x18f   :  { %1041 = vmatpush3.msra.mxu1 %v619_v43 }
 0x190   :  { %1042 = vmatprep.subr.mxu1 %v1329_v16 }
 0x191   :  { %1043 = vmatpush3.msra.mxu1 %v618_v44 }
 0x192   :  { %1044 = vmatprep.subr.mxu1 %v1329_v16 }
 0x193   :  { %1045 = vmatpush3.msra.mxu1 %v617_v45 }
 0x194   :  { %1046 = vmatprep.subr.mxu1 %v1329_v16 }
 0x195   :  { %1047 = vmatpush3.msra.mxu1 %v616_v46 }
 0x196   :  { %1048 = vmatprep.subr.mxu1 %v1329_v16 }
 0x197   :  { %1049 = vmatpush3.msra.mxu1 %v615_v49 }
 0x198   :  { %1050 = vmatprep.subr.mxu1 %v1329_v16 }
 0x199   :  { %1051 = vmatpush3.msra.mxu1 %v614_v51 }
 0x19a   :  { %1052 = vmatprep.subr.mxu1 %v1329_v16 }
 0x19b   :  { %1053 = vmatpush3.msra.mxu1 %v613_v53 }
 0x19c   :  { %1054 = vmatprep.subr.mxu1 %v1329_v16 }
 0x19d   :  { %1055 = vmatpush3.msra.mxu1 %v612_v60 }
 0x19e   :  { %1056 = vmatprep.subr.mxu1 %v1329_v16 }
 0x19f   :  { %1057 = vmatpush3.msra.mxu1 %v611_v63 }
 0x1fa   :  { %v516_v1 = vpop.xlane.xlu0 %515 }
 0x1fb   :  { %v540_v5 = vmul.f32 %v859_v3, %v516_v1 }
 0x240   :  { %v509_v54 = vpop.f32.mrf.mxu1 }
 0x241   :  { %1024 = vmatmul.mubr.f32.vlgmr.msra.gmra.mxu0 %v509_v54 }
 0x242   :  { %v989_v55 = vpop.f32.mrf.mxu1  ;;  %1093 = vmatprep.mubr.msk.f32.mxu0 %vm1330_vm0, %v1329_v16  ;;  %1062 = vmatpush3.msra.mxu0 %v726_v9 }
 0x243   :  { %1063 = vmatprep.subr.mxu0 %v1329_v16 }
 0x244   :  { %v512_v58 = vpop.f32.mrf.mxu1  ;;  %1064 = vmatpush3.msra.mxu0 %v725_v11 }
 0x245   :  { %1065 = vmatprep.subr.mxu0 %v1329_v16 }
 0x246   :  { %v990_v59 = vpop.f32.mrf.mxu1  ;;  %1066 = vmatpush3.msra.mxu0 %v724_v12 }
 0x247   :  { %1067 = vmatprep.subr.mxu0 %v1329_v16 }
 0x248   :  { %1068 = vmatpush3.msra.mxu0 %v723_v61 }
 0x249   :  { %1069 = vmatprep.subr.mxu0 %v1329_v16 }
 0x24a   :  { %1070 = vmatpush3.msra.mxu0 %v722_v13 }
 0x24b   :  { %1071 = vmatprep.subr.mxu0 %v1329_v16 }
 0x24c   :  { %1072 = vmatpush3.msra.mxu0 %v721_v52 }
 0x24d   :  { %1073 = vmatprep.subr.mxu0 %v1329_v16 }
 0x24e   :  { %1074 = vmatpush3.msra.mxu0 %v720_v14 }
 0x24f   :  { %1075 = vmatprep.subr.mxu0 %v1329_v16 }
 0x250   :  { %1076 = vmatpush3.msra.mxu0 %v719_v15 }
 0x251   :  { %1077 = vmatprep.subr.mxu0 %v1329_v16 }
 0x252   :  { %1078 = vmatpush3.msra.mxu0 %v718_v17 }
 0x253   :  { %1079 = vmatprep.subr.mxu0 %v1329_v16 }
 0x254   :  { %1080 = vmatpush3.msra.mxu0 %v717_v19 }
 0x255   :  { %1081 = vmatprep.subr.mxu0 %v1329_v16 }
 0x256   :  { %1082 = vmatpush3.msra.mxu0 %v716_v47 }
 0x257   :  { %1083 = vmatprep.subr.mxu0 %v1329_v16 }
 0x258   :  { %1084 = vmatpush3.msra.mxu0 %v715_v20 }
 0x259   :  { %1085 = vmatprep.subr.mxu0 %v1329_v16 }
 0x25a   :  { %1086 = vmatpush3.msra.mxu0 %v714_v50 }
 0x25b   :  { %1087 = vmatprep.subr.mxu0 %v1329_v16 }
 0x25c   :  { %1088 = vmatpush3.msra.mxu0 %v713_v22 }
 0x25d   :  { %1089 = vmatprep.subr.mxu0 %v1329_v16 }
 0x25e   :  { %1090 = vmatpush3.msra.mxu0 %v712_v23 }
 0x25f   :  { %1091 = vmatprep.subr.mxu0 %v1329_v16  ;;  %v862_v16 = vld [vmem:[%s1569_s9] ss:$0 sm:$0xff] }
 0x260   :  { %1092 = vmatpush3.msra.mxu0 %v711_v24 }
 0x301   :  { %v607_v8 = vpop.f32.mrf.mxu0 }
 0x302   :  { %v608_v48 = vadd.f32 %v607_v8, %v540_v5 }
 0x303   :  { %v1025_v56 = vpop.f32.mrf.mxu0 }
 0x304   :  { %1059 = vmatmul.mubr.f32.vlgmr.msra.gmra.mxu1 %v608_v48 }
 0x3c4   :  { %v700_v57 = vpop.f32.mrf.mxu1 }
 0x3c5   :  { %v701_v26 = vadd.f32 %v860_v25, %v700_v57 }
 0x3c6   :  { %v1060_v27 = vpop.f32.mrf.mxu1 }
 0x3c7   :  { %v861_v62 = vmul.f32 -1.442695, %v701_v26 }
 0x3c9   :  { %1188 = vpow2.f32 %v861_v62 }
 0x3d6   :  { %v1189_v28 = vpop.eup %1188 }
 0x3d7   :  { %v707_v29 = vadd.f32 1.0, %v1189_v28 }
 0x3d9   :  { %1190 = vrcp.f32 %v707_v29 }
 0x3e6   :  { %v1191_v0 = vpop.eup %1190 }
 0x3e7   :  { %v710_v30 = vmul.f32 %v1191_v0, %v701_v26 }
 0x3e9   :  { %1094 = vmatmul.mubr.f32.vlgmr.msra.gmra.mxu0 %v710_v30 }
 0x4a9   :  { %v800_v31 = vpop.f32.mrf.mxu0 }
 0x4aa   :  { %v801_v2 = vadd.f32 %v862_v16, %v800_v31 }
 0x4ab   :  { %v1095_v32 = vpop.f32.mrf.mxu0 }
 0x4ac   :  { %804 = vst [vmem:[#allocation11] sm:$0xff] %v801_v2 }
 0x4ad   :  { %1303 = shalt.err (!%p1300_p1)
}
 0x4ae   :  { %814 = dma.vmem_to_hbm [thread:$0]  %s812_s25, 128, %s1570_s10, [#allocation4]  }
 0x4af   :  { %1318 = dma.done.wait [#allocation4], 128  }
 0x4b0   :  { %1319 = vsyncadd [#allocation4], 4294967168 }
 0x4b1   :  { %818 = vsyncpa [#allocation3], 1 }
 0x4b2   :  { %819 = vsyncpa [#allocation6], 1 }
 0x4b3   :  { %820 = vsyncpa [#allocation9], 1 }
 0x4b4   :  { %821 = vsyncpa [#allocation4], 1 }

// kernel: tpu_custom_call.1
= control target key start
LH: loop header
LB: loop body
LE: loop exit
PB: predicated region body
PF: predicated region fallthrough
CT: control target
= control target key end

     0   :  { %15 = vsyncpa [#allocation3], 0  ;;  %s1560_s0 = inlined_call_operand.hbm [shape: bf16[8,16,128], index: 0, kind: input, shape index: {}]   ;;  %s1561_s1 = inlined_call_operand.vmem [shape: f32[1,1,128], index: 1, kind: input, shape index: {}]   ;;  %s1562_s2 = inlined_call_operand.hbm [shape: bf16[128,128], index: 2, kind: input, shape index: {}]   ;;  %s1563_s3 = inlined_call_operand.vmem [shape: f32[1,128], index: 3, kind: input, shape index: {}]   ;;  %s1564_s4 = inlined_call_operand.hbm [shape: f32[128,128], index: 4, kind: input, shape index: {}]   ;;  %s1565_s5 = inlined_call_operand.vmem [shape: f32[1,128], index: 5, kind: input, shape index: {}]   ;;  %s1566_s6 = inlined_call_operand.hbm [shape: f32[128,128], index: 6, kind: input, shape index: {}]   ;;  %s1567_s7 = inlined_call_operand.vmem [shape: f32[1,128], index: 7, kind: input, shape index: {}]   ;;  %s1568_s8 = inlined_call_operand.hbm [shape: f32[128,128], index: 8, kind: input, shape index: {}]   ;;  %s1569_s9 = inlined_call_operand.vmem [shape: f32[1,128], index: 9, kind: input, shape index: {}]   ;;  %s1570_s10 = inlined_call_operand.hbm [shape: f32[8,128], index: 10, kind: output, shape index: {}]  }
   0x1   :  { %16 = vsyncpa [#allocation6], 0 }
   0x2   :  { %17 = vsyncpa [#allocation9], 0 }
   0x3   :  { %18 = vsyncpa [#allocation4], 0  ;;  %s1320_s13 = smov [#allocation5]  }
   0x4   :  { %s38_s14 = sshll.u32 %s1320_s13, 4  ;;  %s39_s14 = int_to_ptr.vmem [resolvable:$true] %s38_s14 }
   0x5   :  { %s1200_s15 = scalar_lea.vmem %s39_s14, 1024  ;;  %p1205_p1 = scmp.lt.s32.totalorder %s39_s14, %s39_s14 }
   0x6   :  { %p1201_p0 = scmp.ne.s32.totalorder %s39_s14, %s1200_s15  ;;  %p1206_p2 = scmp.lt.s32.totalorder %s1200_s15, %s1200_s15 }
   0x8   :  { %p1207_p3 = por %p1206_p2, %p1205_p1 }
   0xa   :  { %p1208_p4 = pnand %p1207_p3, %p1201_p0 }
   0xc   :  { %1211 = shalt.err (!%p1208_p4)
}
   0xd   :  { %s1321_s16 = smov 64   ;;  %s1322_s17 = smov 4  }
   0xe   :  { %44 = dma.hbm_to_vmem [thread:$0]  %s1562_s2, 1024, %s39_s14, [#allocation6], %s1321_s16, %s1321_s16, %s1322_s17  }
   0xf   :  { %s1323_s20 = smov [#allocation8]   ;;  %s1324_s22 = smov [#allocation2]  }
  0x10   :  { %s66_s21 = sshll.u32 %s1323_s20, 4  ;;  %s24_s23 = sshll.u32 %s1324_s22, 4  ;;  %s67_s21 = int_to_ptr.vmem [resolvable:$true] %s66_s21  ;;  %s25_s23 = int_to_ptr.vmem [resolvable:$true] %s24_s23 }
  0x11   :  { %s1220_s24 = scalar_lea.vmem %s67_s21, 2048  ;;  %p1225_p6 = scmp.lt.s32.totalorder %s67_s21, %s67_s21 }
  0x12   :  { %p1221_p5 = scmp.ne.s32.totalorder %s67_s21, %s1220_s24  ;;  %p1226_p7 = scmp.lt.s32.totalorder %s1220_s24, %s1220_s24 }
  0x14   :  { %p1227_p8 = por %p1226_p7, %p1225_p6 }
  0x16   :  { %p1228_p9 = pnand %p1227_p8, %p1221_p5 }
  0x18   :  { %1231 = shalt.err (!%p1228_p9)
}
  0x19   :  { %s1325_s25 = smov 128   ;;  %s1326_s26 = smov 8  }
  0x1a   :  { %72 = dma.hbm_to_vmem [thread:$0]  %s1566_s6, 2048, %s67_s21, [#allocation9], %s1325_s25, %s1325_s25, %s1326_s26  }
  0x1b   :  { %s1240_s2 = scalar_lea.vmem %s25_s23, 1024  ;;  %p1245_p11 = scmp.lt.s32.totalorder %s25_s23, %s25_s23 }
  0x1c   :  { %p1241_p10 = scmp.ne.s32.totalorder %s25_s23, %s1240_s2  ;;  %p1246_p12 = scmp.lt.s32.totalorder %s1240_s2, %s1240_s2 }
  0x1e   :  { %p1247_p13 = por %p1246_p12, %p1245_p11 }
  0x20   :  { %p1248_p0 = pnand %p1247_p13, %p1241_p10 }
  0x22   :  { %1251 = shalt.err (!%p1248_p0)
}
  0x23   :  { %30 = dma.hbm_to_vmem [thread:$0]  %s1560_s0, 1024, %s25_s23, [#allocation3], %s1321_s16, %s1321_s16, %s1322_s17  }
  0x24   :  { %s1327_s11 = smov [#allocation7]   ;;  %s1328_s13 = smov [#allocation10]  }
  0x25   :  { %s52_s12 = sshll.u32 %s1327_s11, 4  ;;  %s80_s14 = sshll.u32 %s1328_s13, 4  ;;  %s53_s12 = int_to_ptr.vmem [resolvable:$true] %s52_s12  ;;  %s81_s14 = int_to_ptr.vmem [resolvable:$true] %s80_s14 }
  0x26   :  { %s1260_s15 = scalar_lea.vmem %s53_s12, 2048  ;;  %p1265_p2 = scmp.lt.s32.totalorder %s53_s12, %s53_s12 }
  0x27   :  { %p1261_p1 = scmp.ne.s32.totalorder %s53_s12, %s1260_s15  ;;  %p1266_p3 = scmp.lt.s32.totalorder %s1260_s15, %s1260_s15 }
  0x29   :  { %p1267_p4 = por %p1266_p3, %p1265_p2 }
  0x2b   :  { %p1268_p5 = pnand %p1267_p4, %p1261_p1 }
  0x2d   :  { %1271 = shalt.err (!%p1268_p5)
}
  0x2e   :  { %58 = dma.hbm_to_vmem [thread:$0]  %s1564_s4, 2048, %s53_s12, [#allocation6], %s1325_s25, %s1325_s25, %s1326_s26  }
  0x2f   :  { %s1280_s0 = scalar_lea.vmem %s81_s14, 2048  ;;  %p1285_p7 = scmp.lt.s32.totalorder %s81_s14, %s81_s14 }
  0x30   :  { %p1281_p6 = scmp.ne.s32.totalorder %s81_s14, %s1280_s0  ;;  %p1286_p8 = scmp.lt.s32.totalorder %s1280_s0, %s1280_s0 }
  0x32   :  { %p1287_p9 = por %p1286_p8, %p1285_p7 }
  0x34   :  { %p1288_p10 = pnand %p1287_p9, %p1281_p6 }
  0x36   :  { %1291 = shalt.err (!%p1288_p10)
}
  0x37   :  { %86 = dma.hbm_to_vmem [thread:$0]  %s1568_s8, 2048, %s81_s14, [#allocation9], %s1325_s25, %s1325_s25, %s1326_s26  }
  0x38   :  { %1312 = dma.done.wait [#allocation3], 1024  }
  0x39   :  { %1313 = vsyncadd [#allocation3], 4294966272 }
  0x3a   :  { %1314 = dma.done.wait [#allocation6], 3072  }
  0x3b   :  { %1315 = vsyncadd [#allocation6], 4294964224 }
  0x3c   :  { %1316 = dma.done.wait [#allocation9], 4096  }
  0x3d   :  { %1317 = vsyncadd [#allocation9], 4294963200  ;;  %v1108_v0 = vld [vmem:[#allocation5 + $0x38] sm:$0xff]   ;;  %v1109_v1 = vld [vmem:[#allocation5 + $0x30] sm:$0xff]   ;;  %v1329_v16 = vmov 0.0   ;;  %vm1330_vm0 = vmmov 0  }
  0x3e   :  { %939 = vmatprep.subr.bf16.mxu0 %v1108_v0  ;;  %v1110_v2 = vld [vmem:[#allocation5 + $0x28] sm:$0xff]   ;;  %v1111_v3 = vld [vmem:[#allocation5 + $0x20] sm:$0xff]   ;;  %v1112_v5 = vld [vmem:[#allocation5 + $0x18] sm:$0xff]   ;;  %971 = vmatprep.subr.bf16.mxu1 %v1329_v16  ;;  %s1331_s24 = smov [#allocation11]  }
  0x3f   :  { %940 = vmatpush3.bf16.msra.mxu0 %v1108_v0  ;;  %v1116_v4 = vld [vmem:[#allocation2] sm:$0xff]   ;;  %v1113_v6 = vld [vmem:[#allocation5 + $0x10] sm:$0xff]   ;;  %v1114_v7 = vld [vmem:[#allocation5 + $0x8] sm:$0xff]   ;;  %987 = vmatprep.mubr.msk.bf16.mxu1 %vm1330_vm0, %v1329_v16  ;;  %s811_s25 = sshll.u32 %s1331_s24, 4  ;;  %s812_s25 = int_to_ptr.vmem [resolvable:$true] %s811_s25 }
  0x40   :  { %941 = vmatprep.subr.bf16.mxu0 %v1109_v1  ;;  %955 = vmatprep.mubr.bf16.mxu0 %v1116_v4  ;;  %v1115_v8 = vld [vmem:[#allocation5] sm:$0xff]   ;;  %v1117_v9 = vld [vmem:[#allocation2 + $0x8] sm:$0xff]   ;;  %v1118_v10 = vld [vmem:[#allocation2 + $0x10] sm:$0xff]   ;;  %p1297_p12 = scmp.lt.s32.totalorder %s812_s25, %s812_s25 }
  0x41   :  { %v1119_v11 = vld [vmem:[#allocation2 + $0x18] sm:$0xff]   ;;  %v1120_v12 = vld [vmem:[#allocation2 + $0x20] sm:$0xff]   ;;  %v1121_v13 = vld [vmem:[#allocation2 + $0x28] sm:$0xff]  }
  0x42   :  { %v1122_v14 = vld [vmem:[#allocation2 + $0x30] sm:$0xff]   ;;  %v1123_v15 = vld [vmem:[#allocation2 + $0x38] sm:$0xff]   ;;  %v530_v19 = vld [vmem:[#allocation7 + $0x68] sm:$0xff] }
  0x43   :  { %942 = vmatpush3.bf16.msra.mxu0 %v1109_v1  ;;  %v532_v17 = vld [vmem:[#allocation7 + $0x78] sm:$0xff]  ;;  %v531_v18 = vld [vmem:[#allocation7 + $0x70] sm:$0xff]  ;;  %v529_v20 = vld [vmem:[#allocation7 + $0x60] sm:$0xff] }
  0x44   :  { %943 = vmatprep.subr.bf16.mxu0 %v1110_v2  ;;  %v528_v21 = vld [vmem:[#allocation7 + $0x58] sm:$0xff]  ;;  %v527_v22 = vld [vmem:[#allocation7 + $0x50] sm:$0xff]  ;;  %v526_v23 = vld [vmem:[#allocation7 + $0x48] sm:$0xff] }
  0x45   :  { %v525_v24 = vld [vmem:[#allocation7 + $0x40] sm:$0xff]  ;;  %v524_v25 = vld [vmem:[#allocation7 + $0x38] sm:$0xff]  ;;  %v523_v26 = vld [vmem:[#allocation7 + $0x30] sm:$0xff] }
  0x46   :  { %v522_v27 = vld [vmem:[#allocation7 + $0x28] sm:$0xff]  ;;  %v521_v28 = vld [vmem:[#allocation7 + $0x20] sm:$0xff]  ;;  %v520_v29 = vld [vmem:[#allocation7 + $0x18] sm:$0xff] }
  0x47   :  { %944 = vmatpush3.bf16.msra.mxu0 %v1110_v2  ;;  %v519_v30 = vld [vmem:[#allocation7 + $0x10] sm:$0xff]  ;;  %v518_v31 = vld [vmem:[#allocation7 + $0x8] sm:$0xff]  ;;  %v517_v32 = vld [vmem:[#allocation7] sm:$0xff] }
  0x48   :  { %945 = vmatprep.subr.bf16.mxu0 %v1111_v3  ;;  %v822_v45 = vld [vmem:[%s1563_s3] ss:$0 sm:$0xff] }
  0x4b   :  { %946 = vmatpush3.bf16.msra.mxu0 %v1111_v3 }
  0x4c   :  { %947 = vmatprep.subr.bf16.mxu0 %v1112_v5 }
  0x4f   :  { %948 = vmatpush3.bf16.msra.mxu0 %v1112_v5 }
  0x50   :  { %949 = vmatprep.subr.bf16.mxu0 %v1113_v6 }
  0x53   :  { %950 = vmatpush3.bf16.msra.mxu0 %v1113_v6 }
  0x54   :  { %951 = vmatprep.subr.bf16.mxu0 %v1114_v7 }
  0x57   :  { %952 = vmatpush3.bf16.msra.mxu0 %v1114_v7 }
  0x58   :  { %953 = vmatprep.subr.bf16.mxu0 %v1115_v8 }
  0x5b   :  { %954 = vmatpush3.bf16.msra.mxu0 %v1115_v8 }
  0x5c   :  { %991 = vmatprep.subr.mxu0 %v1329_v16 }
  0x5e   :  { %956 = vmatmul.mubr.bf16.vlgmr.msra.gmra.mxu0 %v1117_v9 }
  0x5f   :  { %959 = vmatprep.mubr.bf16.mxu0 %v1118_v10  ;;  %992 = vmatpush3.msra.mxu0 %v532_v17 }
  0x60   :  { %993 = vmatprep.subr.mxu0 %v1329_v16 }
  0x61   :  { %994 = vmatpush3.msra.mxu0 %v531_v18 }
  0x62   :  { %995 = vmatprep.subr.mxu0 %v1329_v16 }
  0x63   :  { %996 = vmatpush3.msra.mxu0 %v530_v19 }
  0x64   :  { %997 = vmatprep.subr.mxu0 %v1329_v16 }
  0x65   :  { %998 = vmatpush3.msra.mxu0 %v529_v20 }
  0x66   :  { %960 = vmatmul.mubr.bf16.gmra.mxu0 %v1119_v11  ;;  %999 = vmatprep.subr.mxu0 %v1329_v16 }
  0x67   :  { %963 = vmatprep.mubr.bf16.mxu0 %v1120_v12  ;;  %1000 = vmatpush3.msra.mxu0 %v528_v21 }
  0x68   :  { %1001 = vmatprep.subr.mxu0 %v1329_v16 }
  0x69   :  { %1002 = vmatpush3.msra.mxu0 %v527_v22 }
  0x6a   :  { %1003 = vmatprep.subr.mxu0 %v1329_v16 }
  0x6b   :  { %1004 = vmatpush3.msra.mxu0 %v526_v23 }
  0x6c   :  { %1005 = vmatprep.subr.mxu0 %v1329_v16 }
  0x6d   :  { %1006 = vmatpush3.msra.mxu0 %v525_v24 }
  0x6e   :  { %964 = vmatmul.mubr.bf16.gmra.mxu0 %v1121_v13  ;;  %1007 = vmatprep.subr.mxu0 %v1329_v16 }
  0x6f   :  { %967 = vmatprep.mubr.bf16.mxu0 %v1122_v14  ;;  %1008 = vmatpush3.msra.mxu0 %v524_v25 }
  0x70   :  { %1009 = vmatprep.subr.mxu0 %v1329_v16 }
  0x71   :  { %1010 = vmatpush3.msra.mxu0 %v523_v26 }
  0x72   :  { %1011 = vmatprep.subr.mxu0 %v1329_v16 }
  0x73   :  { %1012 = vmatpush3.msra.mxu0 %v522_v27 }
  0x74   :  { %1013 = vmatprep.subr.mxu0 %v1329_v16 }
  0x75   :  { %1014 = vmatpush3.msra.mxu0 %v521_v28 }
  0x76   :  { %968 = vmatmul.mubr.bf16.gmra.mxu0 %v1123_v15  ;;  %1015 = vmatprep.subr.mxu0 %v1329_v16 }
  0x77   :  { %1023 = vmatprep.mubr.msk.f32.mxu0 %vm1330_vm0, %v1329_v16  ;;  %1016 = vmatpush3.msra.mxu0 %v520_v29 }
  0x78   :  { %1017 = vmatprep.subr.mxu0 %v1329_v16 }
  0x79   :  { %1018 = vmatpush3.msra.mxu0 %v519_v30 }
  0x7a   :  { %1019 = vmatprep.subr.mxu0 %v1329_v16 }
  0x7b   :  { %1020 = vmatpush3.msra.mxu0 %v518_v31 }
  0x7c   :  { %1021 = vmatprep.subr.mxu0 %v1329_v16 }
  0x7d   :  { %1022 = vmatpush3.msra.mxu0 %v517_v32 }
  0x7e   :  { %1061 = vmatprep.subr.mxu0 %v1329_v16 }
 0x11e   :  { %v957_v33 = vpop.f32.mrf.mxu0 }
 0x11f   :  { %v1466_v4 = vadd.f32 %v957_v33, %v822_v45 }
 0x120   :  { %v1432_v34 = vpop.f32.mrf.mxu0 }
 0x121   :  { %v841_v9 = vmul.f32 -1.442695, %v1466_v4  ;;  %v1483_v21 = vadd.f32 %v822_v45, %v1432_v34 }
 0x122   :  { %v958_v35 = vpop.f32.mrf.mxu0 }
 0x123   :  { %v1475_v10 = vadd.f32 %v958_v35, %v822_v45  ;;  %v839_v30 = vmul.f32 -1.442695, %v1483_v21 }
 0x124   :  { %v277_v36 = vpop.f32.mrf.mxu0 }
 0x125   :  { %v842_v17 = vmul.f32 -1.442695, %v1475_v10  ;;  %v1480_v18 = vadd.f32 %v822_v45, %v277_v36 }
 0x126   :  { %v961_v37 = vpop.f32.mrf.mxu0 }
 0x127   :  { %v1463_v2 = vadd.f32 %v961_v37, %v822_v45  ;;  %v840_v26 = vmul.f32 -1.442695, %v1480_v18 }
 0x128   :  { %v290_v38 = vpop.f32.mrf.mxu0 }
 0x129   :  { %v1471_v7 = vadd.f32 %v822_v45, %v290_v38  ;;  %v845_v8 = vmul.f32 -1.442695, %v1463_v2 }
 0x12a   :  { %v962_v39 = vpop.f32.mrf.mxu0 }
 0x12b   :  { %v1460_v0 = vadd.f32 %v962_v39, %v822_v45  ;;  %v843_v13 = vmul.f32 -1.442695, %v1471_v7 }
 0x12c   :  { %v293_v40 = vpop.f32.mrf.mxu0 }
 0x12d   :  { %v846_v5 = vmul.f32 -1.442695, %v1460_v0  ;;  %v1469_v6 = vadd.f32 %v822_v45, %v293_v40 }
 0x12e   :  { %v965_v41 = vpop.f32.mrf.mxu0 }
 0x12f   :  { %v1442_v50 = vadd.f32 %v965_v41, %v822_v45  ;;  %v844_v11 = vmul.f32 -1.442695, %v1469_v6 }
 0x130   :  { %v306_v42 = vpop.f32.mrf.mxu0 }
 0x131   :  { %v849_v59 = vmul.f32 -1.442695, %v1442_v50  ;;  %v1457_v62 = vadd.f32 %v822_v45, %v306_v42 }
 0x132   :  { %v966_v43 = vpop.f32.mrf.mxu0 }
 0x133   :  { %v1438_v47 = vadd.f32 %v966_v43, %v822_v45  ;;  %v847_v3 = vmul.f32 -1.442695, %v1457_v62 }
 0x134   :  { %v309_v44 = vpop.f32.mrf.mxu0 }
 0x135   :  { %v850_v54 = vmul.f32 -1.442695, %v1438_v47  ;;  %v1451_v57 = vadd.f32 %v822_v45, %v309_v44 }
 0x136   :  { %v969_v46 = vpop.f32.mrf.mxu0 }
 0x137   :  { %v1440_v48 = vadd.f32 %v969_v46, %v822_v45  ;;  %v848_v1 = vmul.f32 -1.442695, %v1451_v57 }
 0x138   :  { %v322_v49 = vpop.f32.mrf.mxu0 }
 0x139   :  { %v853_v51 = vmul.f32 -1.442695, %v1440_v48  ;;  %v1445_v52 = vadd.f32 %v822_v45, %v322_v49 }
 0x13a   :  { %v970_v53 = vpop.f32.mrf.mxu0 }
 0x13b   :  { %v851_v55 = vmul.f32 -1.442695, %v1445_v52  ;;  %v1449_v56 = vadd.f32 %v970_v53, %v822_v45  ;;  %1124 = vpow2.f32 %v853_v51 }
 0x13c   :  { %v325_v58 = vpop.f32.mrf.mxu0 }
 0x13d   :  { %v854_v60 = vmul.f32 -1.442695, %v1449_v56  ;;  %v1455_v61 = vadd.f32 %v822_v45, %v325_v58  ;;  %1126 = vpow2.f32 %v851_v55 }
 0x13e   :  { %1128 = vpow2.f32 %v850_v54 }
 0x13f   :  { %v852_v63 = vmul.f32 -1.442695, %v1455_v61  ;;  %1130 = vpow2.f32 %v854_v60 }
 0x140   :  { %1132 = vpow2.f32 %v849_v59 }
 0x141   :  { %1134 = vpow2.f32 %v852_v63 }
 0x142   :  { %1136 = vpow2.f32 %v848_v1 }
 0x143   :  { %1138 = vpow2.f32 %v847_v3 }
 0x144   :  { %1140 = vpow2.f32 %v846_v5 }
 0x145   :  { %1142 = vpow2.f32 %v845_v8 }
 0x146   :  { %1144 = vpow2.f32 %v841_v9 }
 0x147   :  { %1146 = vpow2.f32 %v844_v11 }
 0x148   :  { %v1125_v12 = vpop.eup %1124  ;;  %1148 = vpow2.f32 %v843_v13 }
 0x149   :  { %v399_v14 = vadd.f32 1.0, %v1125_v12 }
 0x14a   :  { %v1127_v15 = vpop.eup %1126 }
 0x14b   :  { %v1129_v19 = vpop.eup %1128  ;;  %v397_v22 = vadd.f32 1.0, %v1127_v15  ;;  %1150 = vrcp.f32 %v399_v14  ;;  %v449_v15 = vlaneseq }
 0x14c   :  { %v1131_v20 = vpop.eup %1130  ;;  %1152 = vpow2.f32 %v842_v17  ;;  %v396_v27 = vadd.f32 1.0, %v1129_v19 }
 0x14d   :  { %v1133_v23 = vpop.eup %1132  ;;  %v400_v24 = vadd.f32 1.0, %v1131_v20 }
 0x14e   :  { %v1135_v25 = vpop.eup %1134  ;;  %v395_v31 = vadd.f32 1.0, %v1133_v23 }
 0x14f   :  { %1154 = vrcp.f32 %v400_v24  ;;  %v398_v28 = vadd.f32 1.0, %v1135_v25  ;;  %v1137_v29 = vpop.eup %1136 }
 0x150   :  { %1156 = vrcp.f32 %v397_v22  ;;  %v1139_v32 = vpop.eup %1138  ;;  %v394_v33 = vadd.f32 1.0, %v1137_v29  ;;  %v450_v22 = vshrl.u32 %v449_v15, 7 }
 0x151   :  { %1158 = vrcp.f32 %v398_v28  ;;  %v1141_v34 = vpop.eup %1140  ;;  %v393_v35 = vadd.f32 1.0, %v1139_v32 }
 0x152   :  { %1160 = vpow2.f32 %v840_v26  ;;  %v1143_v36 = vpop.eup %1142  ;;  %v392_v38 = vadd.f32 1.0, %v1141_v34 }
 0x153   :  { %1162 = vrcp.f32 %v396_v27  ;;  %v1145_v37 = vpop.eup %1144  ;;  %v391_v41 = vadd.f32 1.0, %v1143_v36  ;;  %v453_v27 = vmul.u32 16, %v450_v22  ;;  %v713_v22 = vld [vmem:[#allocation10 + $0x10] sm:$0xff] }
 0x154   :  { %1164 = vpow2.f32 %v839_v30  ;;  %v1147_v39 = vpop.eup %1146  ;;  %v387_v3 = vadd.f32 1.0, %v1145_v37  ;;  %v625_v37 = vld [vmem:[#allocation8 + $0x70] sm:$0xff] }
 0x155   :  { %1166 = vrcp.f32 %v395_v31  ;;  %v1149_v40 = vpop.eup %1148  ;;  %v390_v44 = vadd.f32 1.0, %v1147_v39  ;;  %v452_v31 = vand.u32 127, %v449_v15  ;;  %v623_v39 = vld [vmem:[#allocation8 + $0x60] sm:$0xff] }
 0x156   :  { %1168 = vrcp.f32 %v394_v33  ;;  %v389_v49 = vadd.f32 1.0, %v1149_v40  ;;  %v622_v40 = vld [vmem:[#allocation8 + $0x58] sm:$0xff]  ;;  %v719_v15 = vld [vmem:[#allocation10 + $0x40] sm:$0xff] }
 0x157   :  { %1170 = vrcp.f32 %v393_v35  ;;  %vm454_vm1 = vcmp.ge.s32.totalorder %v452_v31, %v453_v27 }
 0x158   :  { %v1151_v42 = vpop.eup %1150  ;;  %1172 = vrcp.f32 %v392_v38  ;;  %v624_v38 = vld [vmem:[#allocation8 + $0x68] sm:$0xff] }
 0x159   :  { %v1153_v43 = vpop.eup %1152  ;;  %1174 = vrcp.f32 %v391_v41  ;;  %v447_v51 = vmul.f32 %v1151_v42, %v1440_v48  ;;  %v621_v41 = vld [vmem:[#allocation8 + $0x50] sm:$0xff]  ;;  %v620_v42 = vld [vmem:[#allocation8 + $0x48] sm:$0xff] }
 0x15a   :  { %v388_v58 = vadd.f32 1.0, %v1153_v43  ;;  %1176 = vrcp.f32 %v390_v44  ;;  %v619_v43 = vld [vmem:[#allocation8 + $0x40] sm:$0xff]  ;;  %v618_v44 = vld [vmem:[#allocation8 + $0x38] sm:$0xff] }
 0x15b   :  { %1178 = vrcp.f32 %v389_v49  ;;  %v615_v49 = vld [vmem:[#allocation8 + $0x20] sm:$0xff] }
 0x15c   :  { %v1155_v45 = vpop.eup %1154  ;;  %1180 = vrcp.f32 %v388_v58 }
 0x15d   :  { %v1157_v46 = vpop.eup %1156  ;;  %v448_v53 = vmul.f32 %v1155_v45, %v1449_v56  ;;  %1182 = vrcp.f32 %v387_v3  ;;  %v617_v45 = vld [vmem:[#allocation8 + $0x30] sm:$0xff]  ;;  %v859_v3 = vld [vmem:[%s1565_s5] ss:$0 sm:$0xff] }
 0x15e   :  { %v1159_v54 = vpop.eup %1158  ;;  %v445_v5 = vmul.f32 %v1157_v46, %v1445_v52  ;;  %v616_v46 = vld [vmem:[#allocation8 + $0x28] sm:$0xff] }
 0x15f   :  { %v1161_v55 = vpop.eup %1160  ;;  %v446_v59 = vmul.f32 %v1159_v54, %v1455_v61  ;;  %v474_v60 = vpack.c.bf16 %v448_v53, %v447_v51  ;;  %v614_v51 = vld [vmem:[#allocation8 + $0x18] sm:$0xff]  ;;  %v613_v53 = vld [vmem:[#allocation8 + $0x10] sm:$0xff] }
 0x160   :  { %v1163_v63 = vpop.eup %1162  ;;  %v386_v48 = vadd.f32 1.0, %v1161_v55 }
 0x161   :  { %v1165_v1 = vpop.eup %1164  ;;  %972 = vmatpush3.bf16.msra.mxu1 %v474_v60  ;;  %v444_v56 = vmul.f32 %v1163_v63, %v1438_v47  ;;  %v473_v9 = vpack.c.bf16 %v446_v59, %v445_v5  ;;  %v612_v60 = vld [vmem:[#allocation8 + $0x8] sm:$0xff]  ;;  %v611_v63 = vld [vmem:[#allocation8] sm:$0xff] }
 0x162   :  { %v1167_v8 = vpop.eup %1166  ;;  %973 = vmatprep.subr.bf16.mxu1 %v1329_v16  ;;  %v385_v12 = vadd.f32 1.0, %v1165_v1  ;;  %1184 = vrcp.f32 %v386_v48 }
 0x163   :  { %v1169_v11 = vpop.eup %1168  ;;  %v443_v61 = vmul.f32 %v1167_v8, %v1442_v50 }
 0x164   :  { %v1171_v13 = vpop.eup %1170  ;;  %v442_v52 = vmul.f32 %v1169_v11, %v1451_v57  ;;  %1186 = vrcp.f32 %v385_v12  ;;  %v725_v11 = vld [vmem:[#allocation10 + $0x70] sm:$0xff]  ;;  %v724_v12 = vld [vmem:[#allocation10 + $0x68] sm:$0xff] }
 0x165   :  { %974 = vmatpush3.bf16.msra.mxu1 %v473_v9  ;;  %v472_v14 = vpack.c.bf16 %v444_v56, %v443_v61  ;;  %v1173_v17 = vpop.eup %1172  ;;  %v441_v19 = vmul.f32 %v1171_v13, %v1457_v62  ;;  %v726_v9 = vld [vmem:[#allocation10 + $0x78] sm:$0xff]  ;;  %v723_v61 = vld [vmem:[#allocation10 + $0x60] sm:$0xff] }
 0x166   :  { %975 = vmatprep.subr.bf16.mxu1 %v1329_v16  ;;  %v1175_v47 = vpop.eup %1174  ;;  %v440_v20 = vmul.f32 %v1173_v17, %v1460_v0  ;;  %v722_v13 = vld [vmem:[#allocation10 + $0x58] sm:$0xff] }
 0x167   :  { %v471_v50 = vpack.c.bf16 %v442_v52, %v441_v19  ;;  %v1177_v23 = vpop.eup %1176  ;;  %v439_v24 = vmul.f32 %v1175_v47, %v1463_v2  ;;  %v455_v2 = vadd.s32 16, %v453_v27  ;;  %v721_v52 = vld [vmem:[#allocation10 + $0x50] sm:$0xff]  ;;  %v718_v17 = vld [vmem:[#allocation10 + $0x38] sm:$0xff]  ;;  %v716_v47 = vld [vmem:[#allocation10 + $0x28] sm:$0xff] }
 0x168   :  { %v1179_v25 = vpop.eup %1178  ;;  %v438_v57 = vmul.f32 %v1177_v23, %v1469_v6  ;;  %v717_v19 = vld [vmem:[#allocation10 + $0x30] sm:$0xff]  ;;  %v712_v23 = vld [vmem:[#allocation10 + $0x8] sm:$0xff] }
 0x169   :  { %976 = vmatpush3.bf16.msra.mxu1 %v472_v14  ;;  %v470_v26 = vpack.c.bf16 %v440_v20, %v439_v24  ;;  %v1181_v62 = vpop.eup %1180  ;;  %v437_v28 = vmul.f32 %v1179_v25, %v1471_v7  ;;  %vm456_vm2 = vcmp.lt.s32.totalorder %v452_v31, %v455_v2  ;;  %v720_v14 = vld [vmem:[#allocation10 + $0x48] sm:$0xff]  ;;  %v715_v20 = vld [vmem:[#allocation10 + $0x20] sm:$0xff] }
 0x16a   :  { %977 = vmatprep.subr.bf16.mxu1 %v1329_v16  ;;  %v1183_v29 = vpop.eup %1182  ;;  %v436_v0 = vmul.f32 %v1181_v62, %v1475_v10  ;;  %v855_v10 = vld [vmem:[%s1561_s1] ss:$0 sm:$0xff]  ;;  %vm457_vm3 = vmand %vm454_vm1, %vm456_vm2 }
 0x16b   :  { %v469_v30 = vpack.c.bf16 %v438_v57, %v437_v28  ;;  %v435_v33 = vmul.f32 %v1183_v29, %v1466_v4  ;;  %v857_v36 = vpack.c.bf16 %v855_v10, %v855_v10  ;;  %vm856_vm4 = vmpackc.low %vm457_vm3, %vm457_vm3  ;;  %v711_v24 = vld [vmem:[#allocation10] sm:$0xff] }
 0x16c   :  { %v860_v25 = vld [vmem:[%s1567_s7] ss:$0 sm:$0xff]  ;;  %s1292_s7 = scalar_lea.vmem %s812_s25, 128 }
 0x16d   :  { %978 = vmatpush3.bf16.msra.mxu1 %v471_v50  ;;  %v468_v35 = vpack.c.bf16 %v436_v0, %v435_v33  ;;  %v714_v50 = vld [vmem:[#allocation10 + $0x18] sm:$0xff]  ;;  %p1293_p11 = scmp.ne.s32.totalorder %s812_s25, %s1292_s7  ;;  %p1298_p13 = scmp.lt.s32.totalorder %s1292_s7, %s1292_s7 }
 0x16e   :  { %979 = vmatprep.subr.bf16.mxu1 %v1329_v16 }
 0x16f   :  { %v1185_v32 = vpop.eup %1184  ;;  %p1299_p0 = por %p1298_p13, %p1297_p12 }
 0x170   :  { %v434_v6 = vmul.f32 %v1185_v32, %v1480_v18  ;;  %v465_v18 = vsel %vm457_vm3, %v855_v10, 0.0 }
 0x171   :  { %980 = vmatpush3.bf16.msra.mxu1 %v470_v26  ;;  %v1187_v34 = vpop.eup %1186  ;;  %515 = vadd.xlane.f32.xlu0 %v465_v18  ;;  %p1300_p1 = pnand %p1299_p0, %p1293_p11 }
 0x172   :  { %981 = vmatprep.subr.bf16.mxu1 %v1329_v16  ;;  %v433_v7 = vmul.f32 %v1187_v34, %v1483_v21  ;;  %v626_v21 = vld [vmem:[#allocation8 + $0x78] sm:$0xff] }
 0x174   :  { %v467_v4 = vpack.c.bf16 %v434_v6, %v433_v7 }
 0x175   :  { %982 = vmatpush3.bf16.msra.mxu1 %v469_v30 }
 0x176   :  { %983 = vmatprep.subr.bf16.mxu1 %v1329_v16 }
 0x179   :  { %984 = vmatpush3.bf16.msra.mxu1 %v468_v35 }
 0x17a   :  { %985 = vmatprep.subr.bf16.mxu1 %v1329_v16 }
 0x17d   :  { %986 = vmatpush3.bf16.msra.mxu1 %v467_v4 }
 0x17e   :  { %1026 = vmatprep.subr.mxu1 %v1329_v16 }
 0x180   :  { %988 = vmatmul.mubr.msk.bf16.vlgmr.msra.gmra.mxu1 %vm856_vm4, %v857_v36 }
 0x181   :  { %1058 = vmatprep.mubr.msk.f32.mxu1 %vm1330_vm0, %v1329_v16  ;;  %1027 = vmatpush3.msra.mxu1 %v626_v21 }
 0x182   :  { %1028 = vmatprep.subr.mxu1 %v1329_v16 }
 0x183   :  { %1029 = vmatpush3.msra.mxu1 %v625_v37 }
 0x184   :  { %1030 = vmatprep.subr.mxu1 %v1329_v16 }
 0x185   :  { %1031 = vmatpush3.msra.mxu1 %v624_v38 }
 0x186   :  { %1032 = vmatprep.subr.mxu1 %v1329_v16 }
 0x187   :  { %1033 = vmatpush3.msra.mxu1 %v623_v39 }
 0x188   :  { %1034 = vmatprep.subr.mxu1 %v1329_v16 }
 0x189   :  { %1035 = vmatpush3.msra.mxu1 %v622_v40 }
 0x18a   :  { %1036 = vmatprep.subr.mxu1 %v1329_v16 }
 0x18b   :  { %1037 = vmatpush3.msra.mxu1 %v621_v41 }
 0x18c   :  { %1038 = vmatprep.subr.mxu1 %v1329_v16 }
 0x18d   :  { %1039 = vmatpush3.msra.mxu1 %v620_v42 }
 0x18e   :  { %1040 = vmatprep.subr.mxu1 %v1329_v16 }
 0x18f   :  { %1041 = vmatpush3.msra.mxu1 %v619_v43 }
 0x190   :  { %1042 = vmatprep.subr.mxu1 %v1329_v16 }
 0x191   :  { %1043 = vmatpush3.msra.mxu1 %v618_v44 }
 0x192   :  { %1044 = vmatprep.subr.mxu1 %v1329_v16 }
 0x193   :  { %1045 = vmatpush3.msra.mxu1 %v617_v45 }
 0x194   :  { %1046 = vmatprep.subr.mxu1 %v1329_v16 }
 0x195   :  { %1047 = vmatpush3.msra.mxu1 %v616_v46 }
 0x196   :  { %1048 = vmatprep.subr.mxu1 %v1329_v16 }
 0x197   :  { %1049 = vmatpush3.msra.mxu1 %v615_v49 }
 0x198   :  { %1050 = vmatprep.subr.mxu1 %v1329_v16 }
 0x199   :  { %1051 = vmatpush3.msra.mxu1 %v614_v51 }
 0x19a   :  { %1052 = vmatprep.subr.mxu1 %v1329_v16 }
 0x19b   :  { %1053 = vmatpush3.msra.mxu1 %v613_v53 }
 0x19c   :  { %1054 = vmatprep.subr.mxu1 %v1329_v16 }
 0x19d   :  { %1055 = vmatpush3.msra.mxu1 %v612_v60 }
 0x19e   :  { %1056 = vmatprep.subr.mxu1 %v1329_v16 }
 0x19f   :  { %1057 = vmatpush3.msra.mxu1 %v611_v63 }
 0x1fa   :  { %v516_v1 = vpop.xlane.xlu0 %515 }
 0x1fb   :  { %v540_v5 = vmul.f32 %v859_v3, %v516_v1 }
 0x240   :  { %v509_v54 = vpop.f32.mrf.mxu1 }
 0x241   :  { %1024 = vmatmul.mubr.f32.vlgmr.msra.gmra.mxu0 %v509_v54 }
 0x242   :  { %v989_v55 = vpop.f32.mrf.mxu1  ;;  %1093 = vmatprep.mubr.msk.f32.mxu0 %vm1330_vm0, %v1329_v16  ;;  %1062 = vmatpush3.msra.mxu0 %v726_v9 }
 0x243   :  { %1063 = vmatprep.subr.mxu0 %v1329_v16 }
 0x244   :  { %v512_v58 = vpop.f32.mrf.mxu1  ;;  %1064 = vmatpush3.msra.mxu0 %v725_v11 }
 0x245   :  { %1065 = vmatprep.subr.mxu0 %v1329_v16 }
 0x246   :  { %v990_v59 = vpop.f32.mrf.mxu1  ;;  %1066 = vmatpush3.msra.mxu0 %v724_v12 }
 0x247   :  { %1067 = vmatprep.subr.mxu0 %v1329_v16 }
 0x248   :  { %1068 = vmatpush3.msra.mxu0 %v723_v61 }
 0x249   :  { %1069 = vmatprep.subr.mxu0 %v1329_v16 }
 0x24a   :  { %1070 = vmatpush3.msra.mxu0 %v722_v13 }
 0x24b   :  { %1071 = vmatprep.subr.mxu0 %v1329_v16 }
 0x24c   :  { %1072 = vmatpush3.msra.mxu0 %v721_v52 }
 0x24d   :  { %1073 = vmatprep.subr.mxu0 %v1329_v16 }
 0x24e   :  { %1074 = vmatpush3.msra.mxu0 %v720_v14 }
 0x24f   :  { %1075 = vmatprep.subr.mxu0 %v1329_v16 }
 0x250   :  { %1076 = vmatpush3.msra.mxu0 %v719_v15 }
 0x251   :  { %1077 = vmatprep.subr.mxu0 %v1329_v16 }
 0x252   :  { %1078 = vmatpush3.msra.mxu0 %v718_v17 }
 0x253   :  { %1079 = vmatprep.subr.mxu0 %v1329_v16 }
 0x254   :  { %1080 = vmatpush3.msra.mxu0 %v717_v19 }
 0x255   :  { %1081 = vmatprep.subr.mxu0 %v1329_v16 }
 0x256   :  { %1082 = vmatpush3.msra.mxu0 %v716_v47 }
 0x257   :  { %1083 = vmatprep.subr.mxu0 %v1329_v16 }
 0x258   :  { %1084 = vmatpush3.msra.mxu0 %v715_v20 }
 0x259   :  { %1085 = vmatprep.subr.mxu0 %v1329_v16 }
 0x25a   :  { %1086 = vmatpush3.msra.mxu0 %v714_v50 }
 0x25b   :  { %1087 = vmatprep.subr.mxu0 %v1329_v16 }
 0x25c   :  { %1088 = vmatpush3.msra.mxu0 %v713_v22 }
 0x25d   :  { %1089 = vmatprep.subr.mxu0 %v1329_v16 }
 0x25e   :  { %1090 = vmatpush3.msra.mxu0 %v712_v23 }
 0x25f   :  { %1091 = vmatprep.subr.mxu0 %v1329_v16  ;;  %v862_v16 = vld [vmem:[%s1569_s9] ss:$0 sm:$0xff] }
 0x260   :  { %1092 = vmatpush3.msra.mxu0 %v711_v24 }
 0x301   :  { %v607_v8 = vpop.f32.mrf.mxu0 }
 0x302   :  { %v608_v48 = vadd.f32 %v607_v8, %v540_v5 }
 0x303   :  { %v1025_v56 = vpop.f32.mrf.mxu0 }
 0x304   :  { %1059 = vmatmul.mubr.f32.vlgmr.msra.gmra.mxu1 %v608_v48 }
 0x3c4   :  { %v700_v57 = vpop.f32.mrf.mxu1 }
 0x3c5   :  { %v701_v26 = vadd.f32 %v860_v25, %v700_v57 }
 0x3c6   :  { %v1060_v27 = vpop.f32.mrf.mxu1 }
 0x3c7   :  { %v861_v62 = vmul.f32 -1.442695, %v701_v26 }
 0x3c9   :  { %1188 = vpow2.f32 %v861_v62 }
 0x3d6   :  { %v1189_v28 = vpop.eup %1188 }
 0x3d7   :  { %v707_v29 = vadd.f32 1.0, %v1189_v28 }
 0x3d9   :  { %1190 = vrcp.f32 %v707_v29 }
 0x3e6   :  { %v1191_v0 = vpop.eup %1190 }
 0x3e7   :  { %v710_v30 = vmul.f32 %v1191_v0, %v701_v26 }
 0x3e9   :  { %1094 = vmatmul.mubr.f32.vlgmr.msra.gmra.mxu0 %v710_v30 }
 0x4a9   :  { %v800_v31 = vpop.f32.mrf.mxu0 }
 0x4aa   :  { %v801_v2 = vadd.f32 %v862_v16, %v800_v31 }
 0x4ab   :  { %v1095_v32 = vpop.f32.mrf.mxu0 }
 0x4ac   :  { %804 = vst [vmem:[#allocation11] sm:$0xff] %v801_v2 }
 0x4ad   :  { %1303 = shalt.err (!%p1300_p1)
}
 0x4ae   :  { %814 = dma.vmem_to_hbm [thread:$0]  %s812_s25, 128, %s1570_s10, [#allocation4]  }
 0x4af   :  { %1318 = dma.done.wait [#allocation4], 128  }
 0x4b0   :  { %1319 = vsyncadd [#allocation4], 4294967168 }
 0x4b1   :  { %818 = vsyncpa [#allocation3], 1 }
 0x4b2   :  { %819 = vsyncpa [#allocation6], 1 }
 0x4b3   :  { %820 = vsyncpa [#allocation9], 1 }
 0x4b4   :  { %821 = vsyncpa [#allocation4], 1 }

</bundles_post_ra>
